<compile_context>
chip_gen: v7x
topology: tpu7x:2x2x1
jax: 0.10.0
libtpu: 0.0.40
codegen_flags: <defaults>
</compile_context>

<pallas_src>
import math
from functools import partial

import numpy as np
import jax
import jax.numpy as jnp
from jax import lax
from jax.experimental import pallas as pl
from jax.experimental.pallas import tpu as pltpu

KSIZE = 5
PAD = KSIZE // 2
LRELU_SLOPE = 0.2
BN_EPS = 1e-5

_VMEM = pl.BlockSpec(memory_space=pltpu.MemorySpace.VMEM)


# ------------------------------ static configs ------------------------------ #

def _layer_cfgs(batch, input_nc, img, ndf):
    """Per-conv-layer static geometry (Python ints baked into the kernel)."""
    chans = [input_nc, ndf, ndf * 2, ndf * 4, ndf * 8]
    strides = [2, 2, 2, 1]
    cfgs = []
    ih = iw = img
    for li in range(4):
        s = strides[li]
        oh = (ih + 2 * PAD - KSIZE) // s + 1
        ow = (iw + 2 * PAD - KSIZE) // s + 1
        hp, wp = ih + 2 * PAD, iw + 2 * PAD
        # Needed so one cross-image strided row read covers every image.
        assert hp % s == 0, "padded height must be divisible by the stride"
        rpi = hp // s                          # strided row-slots per image
        Lp = (batch - 1) * rpi + oh            # strided rows incl. junk rows
        cfgs.append(dict(cin=chans[li], cout=chans[li + 1], s=s,
                         ih=ih, iw=iw, hp=hp, wp=wp, oh=oh, ow=ow,
                         rpi=rpi, Lp=Lp, use_bn=(li > 0)))
        ih, iw = oh, ow
    return cfgs


# -------------------------------- the kernel -------------------------------- #

def _disc_kernel(xp_ref,
                 w1_ref, b1_ref,
                 w2_ref, g2_ref, be2_ref,
                 w3_ref, g3_ref, be3_ref,
                 w4_ref, g4_ref, be4_ref,
                 wh_ref, bh_ref,
                 out_ref,
                 p2_ref, p3_ref, p4_ref,
                 *, cfgs, batch):
    """Fully fused Discriminator forward: 4x (conv5x5 [+BN] +LeakyReLU) + heads."""
    cfg1, cfg2, cfg3, cfg4 = cfgs

    def lane_tile(v, reps):
        # (1, C) -> (1, reps*C) with pattern [v, v, ...] (lane index w*C + c).
        return v if reps == 1 else jnp.concatenate([v] * reps, axis=1)

    def lrelu(z):
        return jnp.maximum(z, LRELU_SLOPE * z)

    def conv(p_ref, w_ref, cfg):
        """5x5 conv as 5 row-Toeplitz matmuls (one per kh).

        p_ref: padded activation, rows = batch*hp, lanes = wp*cin (f32).
        w_ref: (KSIZE, wp*cin, ow*cout) bf16 block-Toeplitz weights.
        Returns the real output rows (batch*oh, ow*cout) in f32 (pre bias/BN).
        """
        s, oh, rpi, Lp = cfg["s"], cfg["oh"], cfg["rpi"], cfg["Lp"]
        owc = cfg["ow"] * cfg["cout"]
        acc = jnp.zeros((Lp, owc), jnp.float32)
        for kh in range(KSIZE):
            if s == 1:
                lhs = p_ref[pl.ds(kh, Lp), :]
            else:
                lhs = p_ref[pl.ds(kh, Lp, stride=s), :]      # strided row read
            acc = acc + jnp.dot(lhs.astype(jnp.bfloat16), w_ref[kh],
                                preferred_element_type=jnp.float32)
        if rpi == oh:                       # no junk rows between images
            return acc
        parts = [acc[n * rpi:n * rpi + oh, :] for n in range(batch)]
        return parts[0] if batch == 1 else jnp.concatenate(parts, axis=0)

    def batchnorm(z, gamma_ref, beta_ref, cfg):
        """Training-mode BatchNorm over (batch, h, w); z rows=batch*oh, lanes=ow*C."""
        ow, cout = cfg["ow"], cfg["cout"]
        inv_n = 1.0 / float(z.shape[0] * ow)
        # Per-channel sums: reduce rows (XLU), then fold the ow lane groups.
        rs = jnp.sum(z, axis=0, keepdims=True)                # (1, ow*cout)
        ch = rs[:, 0:cout]
        for w in range(1, ow):
            ch = ch + rs[:, w * cout:(w + 1) * cout]
        mean = ch * inv_n                                      # (1, cout)
        d = z - lane_tile(mean, ow)
        rs2 = jnp.sum(d * d, axis=0, keepdims=True)            # centered 2-pass var
        ch2 = rs2[:, 0:cout]
        for w in range(1, ow):
            ch2 = ch2 + rs2[:, w * cout:(w + 1) * cout]
        var = ch2 * inv_n
        scale = gamma_ref[...] * lax.rsqrt(var + BN_EPS)       # (1, cout)
        shift = beta_ref[...]
        return d * lane_tile(scale, ow) + lane_tile(shift, ow)

    def scatter(z, dst_ref, cfg_next):
        """Write activation (rows=batch*h, lanes=w*C) into next padded buffer.

        Border zeros are fused into full-row-width stores; the up-front zero
        fill only really matters for the top/bottom PAD rows and is just a
        couple of full-width vreg stores at these buffer sizes.
        """
        ih, iw = cfg_next["ih"], cfg_next["iw"]
        cin, hp = cfg_next["cin"], cfg_next["hp"]
        padc = PAD * cin
        dst_ref[...] = jnp.zeros_like(dst_ref)
        zpad = jnp.zeros((ih, padc), dst_ref.dtype)
        for n in range(batch):
            block = z[n * ih:(n + 1) * ih, :].astype(dst_ref.dtype)
            row = jnp.concatenate([zpad, block, zpad], axis=1)   # (ih, wp*cin)
            dst_ref[pl.ds(n * hp + PAD, ih), :] = row

    # ---- layer 1: conv(s=2) + bias + LeakyReLU -------------------------------
    z = conv(xp_ref, w1_ref, cfg1)
    z = lrelu(z + b1_ref[...])                 # bias pre-tiled to (1, ow*cout)
    scatter(z, p2_ref, cfg2)

    # ---- layer 2: conv(s=2) + BN + LeakyReLU ---------------------------------
    z = conv(p2_ref, w2_ref, cfg2)
    z = lrelu(batchnorm(z, g2_ref, be2_ref, cfg2))
    scatter(z, p3_ref, cfg3)

    # ---- layer 3: conv(s=2) + BN + LeakyReLU ---------------------------------
    z = conv(p3_ref, w3_ref, cfg3)
    z = lrelu(batchnorm(z, g3_ref, be3_ref, cfg3))
    scatter(z, p4_ref, cfg4)

    # ---- layer 4: conv(s=1) + BN + LeakyReLU ---------------------------------
    z = conv(p4_ref, w4_ref, cfg4)
    z = lrelu(batchnorm(z, g4_ref, be4_ref, cfg4))

    # ---- merged Linear heads: one (batch, H*W*C) x (H*W*C, 1+emb) matmul -----
    oh4 = cfg4["oh"]
    feats = []
    for n in range(batch):
        rows = [z[n * oh4 + h:n * oh4 + h + 1, :] for h in range(oh4)]
        feats.append(rows[0] if oh4 == 1 else jnp.concatenate(rows, axis=1))
    features = feats[0] if batch == 1 else jnp.concatenate(feats, axis=0)
    logits = jnp.dot(features.astype(jnp.bfloat16), wh_ref[...],
                     preferred_element_type=jnp.float32) + bh_ref[...]
    out_ref[...] = logits                       # single full-output store


# ------------------------------- init helpers -------------------------------- #

def _toeplitz_weight(w_pt, cfg):
    """(cout, cin, 5, 5) conv kernel -> (5, wp*cin, ow*cout) row-Toeplitz (bf16)."""
    cin, cout, s = cfg["cin"], cfg["cout"], cfg["s"]
    wp, ow = cfg["wp"], cfg["ow"]
    wt = np.zeros((KSIZE, wp * cin, ow * cout), np.float32)
    w_np = np.asarray(w_pt)
    for kh in range(KSIZE):
        for kw in range(KSIZE):
            tap = np.transpose(w_np[:, :, kh, kw])             # (cin, cout)
            for c in range(ow):
                col = c * s + kw                               # padded column
                wt[kh, col * cin:(col + 1) * cin, c * cout:(c + 1) * cout] = tap
    return jnp.asarray(wt, dtype=jnp.bfloat16)


def init_params(key, batch, input_nc, img, ndf, emb):
    cfgs = _layer_cfgs(batch, input_nc, img, ndf)
    keys = jax.random.split(key, 8)
    ki = iter(keys)

    convs = []
    for li, c in enumerate(cfgs):
        cin, cout = c["cin"], c["cout"]
        w_pt = 0.02 * jax.random.normal(next(ki), (cout, cin, KSIZE, KSIZE),
                                        jnp.float32)
        entry = {"w": _toeplitz_weight(w_pt, c)}
        if li == 0:     # only conv1 has a bias (BN layers use bias=False)
            b = 0.02 * jax.random.normal(next(ki), (cout,), jnp.float32)
            entry["b"] = jnp.tile(b, (c["ow"],)).reshape(1, c["ow"] * cout)
        else:           # BatchNorm2d default init
            entry["gamma"] = jnp.ones((1, cout), jnp.float32)
            entry["beta"] = jnp.zeros((1, cout), jnp.float32)
        convs.append(entry)

    last = cfgs[-1]
    C, H, W = last["cout"], last["oh"], last["ow"]
    ff = C * H * W
    # Heads in PyTorch NCHW-flatten row order (idx = c*H*W + h*W + w), merged,
    # then permuted ONCE to the kernel's (h, w, c) order (idx = h*W*C + w*C + c).
    wb = 0.02 * jax.random.normal(next(ki), (ff, 1), jnp.float32)
    wc = 0.02 * jax.random.normal(next(ki), (ff, emb), jnp.float32)
    wh_pt = jnp.concatenate([wb, wc], axis=1)                  # (ff, 1+emb)
    wh = (wh_pt.reshape(C, H, W, 1 + emb).transpose(1, 2, 0, 3)
          .reshape(H * W * C, 1 + emb).astype(jnp.bfloat16))
    bh = 0.02 * jax.random.normal(next(ki), (1, 1 + emb), jnp.float32)

    # TODO(synk): BatchNorm running_mean/running_var (momentum) buffers are not
    # modeled; the forward uses batch statistics, matching a module in train().
    return {"convs": convs, "heads": {"w": wh, "b": bh}}


# -------------------------------- JAX wrapper -------------------------------- #

def build_forward(batch, input_nc, img, ndf, emb):
    cfgs = _layer_cfgs(batch, input_nc, img, ndf)
    cfg1 = cfgs[0]

    # Padded activation buffers for layers 2..4 (f32, rows=batch*hp, lanes=wp*cin).
    scratch = [pltpu.VMEM((batch * c["hp"], c["wp"] * c["cin"]), jnp.float32)
               for c in cfgs[1:]]

    call = pl.pallas_call(
        partial(_disc_kernel, cfgs=cfgs, batch=batch),
        out_shape=jax.ShapeDtypeStruct((batch, 1 + emb), jnp.float32),
        in_specs=[_VMEM] * 14,
        out_specs=_VMEM,
        scratch_shapes=scratch,
    )

    def forward(x_nchw, params):
        # One cheap XLA transpose+pad+reshape for the tiny network input;
        # everything else (conv, BN, activations, heads) runs inside the kernel.
        x = jnp.transpose(x_nchw, (0, 2, 3, 1)).astype(jnp.float32)
        x = jnp.pad(x, ((0, 0), (PAD, PAD), (PAD, PAD), (0, 0)))
        xp = x.reshape(batch * cfg1["hp"], cfg1["wp"] * cfg1["cin"])
        c = params["convs"]
        h = params["heads"]
        logits = call(xp,
                      c[0]["w"], c[0]["b"],
                      c[1]["w"], c[1]["gamma"], c[1]["beta"],
                      c[2]["w"], c[2]["gamma"], c[2]["beta"],
                      c[3]["w"], c[3]["gamma"], c[3]["beta"],
                      h["w"], h["b"])
        return logits[:, :1], logits[:, 1:]

    return jax.jit(forward)


if __name__ == "__main__":
    INPUT_NC, IMG, NDF, EMB, BATCH = 4, 16, 8, 8, 2

    # Sanity-check final_features against the formula in Discriminator.__init__.
    img = IMG
    for _ in range(3):
        img = int(math.floor((img + 2 * PAD - KSIZE) / 2)) + 1
    img = int(math.floor((img + 2 * PAD - KSIZE) / 1)) + 1
    final_features = (NDF * 8) * img * img
    cfgs = _layer_cfgs(BATCH, INPUT_NC, IMG, NDF)
    assert final_features == cfgs[-1]["cout"] * cfgs[-1]["oh"] * cfgs[-1]["ow"]

    key = jax.random.PRNGKey(0)
    kx, kp = jax.random.split(key)
    x = jax.random.normal(kx, (BATCH, INPUT_NC, IMG, IMG), jnp.float32)
    params = init_params(kp, BATCH, INPUT_NC, IMG, NDF, EMB)

    fwd = build_forward(BATCH, INPUT_NC, IMG, NDF, EMB)
    binary_logits, category_logits = fwd(x, params)
    jax.block_until_ready((binary_logits, category_logits))

    assert binary_logits.shape == (BATCH, 1), binary_logits.shape
    assert category_logits.shape == (BATCH, EMB), category_logits.shape
    assert bool(jnp.all(jnp.isfinite(binary_logits)))
    assert bool(jnp.all(jnp.isfinite(category_logits)))
    print("KERNEL_OK")
</pallas_src>

<mosaic_0001>
module attributes {stable_mosaic.version = 11 : i64} {
  func.func @_disc_kernel(%arg0: memref<40x80xf32, #tpu.memory_space<vmem>>, %arg1: memref<5x80x64xbf16, #tpu.memory_space<vmem>>, %arg2: memref<1x64xf32, #tpu.memory_space<vmem>>, %arg3: memref<5x96x64xbf16, #tpu.memory_space<vmem>>, %arg4: memref<1x16xf32, #tpu.memory_space<vmem>>, %arg5: memref<1x16xf32, #tpu.memory_space<vmem>>, %arg6: memref<5x128x64xbf16, #tpu.memory_space<vmem>>, %arg7: memref<1x32xf32, #tpu.memory_space<vmem>>, %arg8: memref<1x32xf32, #tpu.memory_space<vmem>>, %arg9: memref<5x192x128xbf16, #tpu.memory_space<vmem>>, %arg10: memref<1x64xf32, #tpu.memory_space<vmem>>, %arg11: memref<1x64xf32, #tpu.memory_space<vmem>>, %arg12: memref<256x9xbf16, #tpu.memory_space<vmem>>, %arg13: memref<1x9xf32, #tpu.memory_space<vmem>>, %arg14: memref<2x9xf32, #tpu.memory_space<vmem>>, %arg15: memref<24x96xf32, #tpu.memory_space<vmem>>, %arg16: memref<16x128xf32, #tpu.memory_space<vmem>>, %arg17: memref<12x192xf32, #tpu.memory_space<vmem>>) attributes {dimension_semantics = [], scalar_prefetch = 0 : i64, scratch_operands = 3 : i64, tpu.core_type = #tpu.core_type<tc>} {
    %cst = arith.constant 0.000000e+00 : f32
    %0 = vector.broadcast %cst : f32 to vector<18x64xf32>
    %c0 = arith.constant 0 : index
    %c0_0 = arith.constant 0 : index
    %1 = tpu.strided_load %arg0[%c0, %c0_0] {strides = array<i32: 2, 1>} : memref<40x80xf32, #tpu.memory_space<vmem>>, vector<18x80xf32>
    %2 = arith.truncf %1 : vector<18x80xf32> to vector<18x80xbf16>
    %c0_1 = arith.constant 0 : index
    %c0_2 = arith.constant 0 : index
    %c0_3 = arith.constant 0 : index
    %3 = vector.load %arg1[%c0_1, %c0_2, %c0_3] : memref<5x80x64xbf16, #tpu.memory_space<vmem>>, vector<1x80x64xbf16>
    %4 = vector.shape_cast %3 : vector<1x80x64xbf16> to vector<80x64xbf16>
    %cst_4 = arith.constant dense<0.000000e+00> : vector<18x64xf32>
    %5 = tpu.matmul %2, %4, %cst_4 {dimension_numbers = #tpu.dot_dimension_numbers<[1], [0], [0], [1], [0, 0, 1, 1], [], []>} : vector<18x80xbf16>, vector<80x64xbf16>, vector<18x64xf32> -> vector<18x64xf32>
    %6 = arith.addf %0, %5 : vector<18x64xf32>
    %c1 = arith.constant 1 : index
    %c0_5 = arith.constant 0 : index
    %7 = tpu.strided_load %arg0[%c1, %c0_5] {strides = array<i32: 2, 1>} : memref<40x80xf32, #tpu.memory_space<vmem>>, vector<18x80xf32>
    %8 = arith.truncf %7 : vector<18x80xf32> to vector<18x80xbf16>
    %c1_6 = arith.constant 1 : index
    %c0_7 = arith.constant 0 : index
    %c0_8 = arith.constant 0 : index
    %9 = vector.load %arg1[%c1_6, %c0_7, %c0_8] : memref<5x80x64xbf16, #tpu.memory_space<vmem>>, vector<1x80x64xbf16>
    %10 = vector.shape_cast %9 : vector<1x80x64xbf16> to vector<80x64xbf16>
    %cst_9 = arith.constant dense<0.000000e+00> : vector<18x64xf32>
    %11 = tpu.matmul %8, %10, %cst_9 {dimension_numbers = #tpu.dot_dimension_numbers<[1], [0], [0], [1], [0, 0, 1, 1], [], []>} : vector<18x80xbf16>, vector<80x64xbf16>, vector<18x64xf32> -> vector<18x64xf32>
    %12 = arith.addf %6, %11 : vector<18x64xf32>
    %c2 = arith.constant 2 : index
    %c0_10 = arith.constant 0 : index
    %13 = tpu.strided_load %arg0[%c2, %c0_10] {strides = array<i32: 2, 1>} : memref<40x80xf32, #tpu.memory_space<vmem>>, vector<18x80xf32>
    %14 = arith.truncf %13 : vector<18x80xf32> to vector<18x80xbf16>
    %c2_11 = arith.constant 2 : index
    %c0_12 = arith.constant 0 : index
    %c0_13 = arith.constant 0 : index
    %15 = vector.load %arg1[%c2_11, %c0_12, %c0_13] : memref<5x80x64xbf16, #tpu.memory_space<vmem>>, vector<1x80x64xbf16>
    %16 = vector.shape_cast %15 : vector<1x80x64xbf16> to vector<80x64xbf16>
    %cst_14 = arith.constant dense<0.000000e+00> : vector<18x64xf32>
    %17 = tpu.matmul %14, %16, %cst_14 {dimension_numbers = #tpu.dot_dimension_numbers<[1], [0], [0], [1], [0, 0, 1, 1], [], []>} : vector<18x80xbf16>, vector<80x64xbf16>, vector<18x64xf32> -> vector<18x64xf32>
    %18 = arith.addf %12, %17 : vector<18x64xf32>
    %c3 = arith.constant 3 : index
    %c0_15 = arith.constant 0 : index
    %19 = tpu.strided_load %arg0[%c3, %c0_15] {strides = array<i32: 2, 1>} : memref<40x80xf32, #tpu.memory_space<vmem>>, vector<18x80xf32>
    %20 = arith.truncf %19 : vector<18x80xf32> to vector<18x80xbf16>
    %c3_16 = arith.constant 3 : index
    %c0_17 = arith.constant 0 : index
    %c0_18 = arith.constant 0 : index
    %21 = vector.load %arg1[%c3_16, %c0_17, %c0_18] : memref<5x80x64xbf16, #tpu.memory_space<vmem>>, vector<1x80x64xbf16>
    %22 = vector.shape_cast %21 : vector<1x80x64xbf16> to vector<80x64xbf16>
    %cst_19 = arith.constant dense<0.000000e+00> : vector<18x64xf32>
    %23 = tpu.matmul %20, %22, %cst_19 {dimension_numbers = #tpu.dot_dimension_numbers<[1], [0], [0], [1], [0, 0, 1, 1], [], []>} : vector<18x80xbf16>, vector<80x64xbf16>, vector<18x64xf32> -> vector<18x64xf32>
    %24 = arith.addf %18, %23 : vector<18x64xf32>
    %c4 = arith.constant 4 : index
    %c0_20 = arith.constant 0 : index
    %25 = tpu.strided_load %arg0[%c4, %c0_20] {strides = array<i32: 2, 1>} : memref<40x80xf32, #tpu.memory_space<vmem>>, vector<18x80xf32>
    %26 = arith.truncf %25 : vector<18x80xf32> to vector<18x80xbf16>
    %c4_21 = arith.constant 4 : index
    %c0_22 = arith.constant 0 : index
    %c0_23 = arith.constant 0 : index
    %27 = vector.load %arg1[%c4_21, %c0_22, %c0_23] : memref<5x80x64xbf16, #tpu.memory_space<vmem>>, vector<1x80x64xbf16>
    %28 = vector.shape_cast %27 : vector<1x80x64xbf16> to vector<80x64xbf16>
    %cst_24 = arith.constant dense<0.000000e+00> : vector<18x64xf32>
    %29 = tpu.matmul %26, %28, %cst_24 {dimension_numbers = #tpu.dot_dimension_numbers<[1], [0], [0], [1], [0, 0, 1, 1], [], []>} : vector<18x80xbf16>, vector<80x64xbf16>, vector<18x64xf32> -> vector<18x64xf32>
    %30 = arith.addf %24, %29 : vector<18x64xf32>
    %31 = vector.extract_strided_slice %30 {offsets = [0, 0], sizes = [8, 64], strides = [1, 1]} : vector<18x64xf32> to vector<8x64xf32>
    %32 = vector.extract_strided_slice %30 {offsets = [10, 0], sizes = [8, 64], strides = [1, 1]} : vector<18x64xf32> to vector<8x64xf32>
    %33 = tpu.concatenate %31, %32 in 0 : vector<8x64xf32>, vector<8x64xf32> -> vector<16x64xf32>
    %c0_25 = arith.constant 0 : index
    %c0_26 = arith.constant 0 : index
    %34 = vector.load %arg2[%c0_25, %c0_26] : memref<1x64xf32, #tpu.memory_space<vmem>>, vector<1x64xf32>
    %35 = vector.broadcast %34 : vector<1x64xf32> to vector<16x64xf32>
    %36 = arith.addf %33, %35 : vector<16x64xf32>
    %cst_27 = arith.constant 2.000000e-01 : f32
    %37 = vector.broadcast %cst_27 : f32 to vector<16x64xf32>
    %38 = arith.mulf %37, %36 : vector<16x64xf32>
    %39 = arith.maximumf %36, %38 : vector<16x64xf32>
    %cst_28 = arith.constant 0.000000e+00 : f32
    %40 = vector.broadcast %cst_28 : f32 to vector<24x96xf32>
    %c0_29 = arith.constant 0 : index
    %c0_30 = arith.constant 0 : index
    %41 = vector.load %arg15[%c0_29, %c0_30] : memref<24x96xf32, #tpu.memory_space<vmem>>, vector<24x96xf32>
    tpu.vector_store %arg15[%c0_29, %c0_30], %40 {strides = array<i32>} : memref<24x96xf32, #tpu.memory_space<vmem>>, vector<24x96xf32>,
    %cst_31 = arith.constant 0.000000e+00 : f32
    %42 = vector.broadcast %cst_31 : f32 to vector<8x16xf32>
    %43 = vector.extract_strided_slice %39 {offsets = [0, 0], sizes = [8, 64], strides = [1, 1]} : vector<16x64xf32> to vector<8x64xf32>
    %44 = tpu.concatenate %42, %43, %42 in 1 : vector<8x16xf32>, vector<8x64xf32>, vector<8x16xf32> -> vector<8x96xf32>
    %c2_32 = arith.constant 2 : index
    %c0_33 = arith.constant 0 : index
    %45 = vector.load %arg15[%c2_32, %c0_33] : memref<24x96xf32, #tpu.memory_space<vmem>>, vector<8x96xf32>
    tpu.vector_store %arg15[%c2_32, %c0_33], %44 {strides = array<i32>} : memref<24x96xf32, #tpu.memory_space<vmem>>, vector<8x96xf32>,
    %46 = vector.extract_strided_slice %39 {offsets = [8, 0], sizes = [8, 64], strides = [1, 1]} : vector<16x64xf32> to vector<8x64xf32>
    %47 = tpu.concatenate %42, %46, %42 in 1 : vector<8x16xf32>, vector<8x64xf32>, vector<8x16xf32> -> vector<8x96xf32>
    %c14 = arith.constant 14 : index
    %c0_34 = arith.constant 0 : index
    %48 = vector.load %arg15[%c14, %c0_34] : memref<24x96xf32, #tpu.memory_space<vmem>>, vector<8x96xf32>
    tpu.vector_store %arg15[%c14, %c0_34], %47 {strides = array<i32>} : memref<24x96xf32, #tpu.memory_space<vmem>>, vector<8x96xf32>,
    %cst_35 = arith.constant 0.000000e+00 : f32
    %49 = vector.broadcast %cst_35 : f32 to vector<10x64xf32>
    %c0_36 = arith.constant 0 : index
    %c0_37 = arith.constant 0 : index
    %50 = tpu.strided_load %arg15[%c0_36, %c0_37] {strides = array<i32: 2, 1>} : memref<24x96xf32, #tpu.memory_space<vmem>>, vector<10x96xf32>
    %51 = arith.truncf %50 : vector<10x96xf32> to vector<10x96xbf16>
    %c0_38 = arith.constant 0 : index
    %c0_39 = arith.constant 0 : index
    %c0_40 = arith.constant 0 : index
    %52 = vector.load %arg3[%c0_38, %c0_39, %c0_40] : memref<5x96x64xbf16, #tpu.memory_space<vmem>>, vector<1x96x64xbf16>
    %53 = vector.shape_cast %52 : vector<1x96x64xbf16> to vector<96x64xbf16>
    %cst_41 = arith.constant dense<0.000000e+00> : vector<10x64xf32>
    %54 = tpu.matmul %51, %53, %cst_41 {dimension_numbers = #tpu.dot_dimension_numbers<[1], [0], [0], [1], [0, 0, 1, 1], [], []>} : vector<10x96xbf16>, vector<96x64xbf16>, vector<10x64xf32> -> vector<10x64xf32>
    %55 = arith.addf %49, %54 : vector<10x64xf32>
    %c1_42 = arith.constant 1 : index
    %c0_43 = arith.constant 0 : index
    %56 = tpu.strided_load %arg15[%c1_42, %c0_43] {strides = array<i32: 2, 1>} : memref<24x96xf32, #tpu.memory_space<vmem>>, vector<10x96xf32>
    %57 = arith.truncf %56 : vector<10x96xf32> to vector<10x96xbf16>
    %c1_44 = arith.constant 1 : index
    %c0_45 = arith.constant 0 : index
    %c0_46 = arith.constant 0 : index
    %58 = vector.load %arg3[%c1_44, %c0_45, %c0_46] : memref<5x96x64xbf16, #tpu.memory_space<vmem>>, vector<1x96x64xbf16>
    %59 = vector.shape_cast %58 : vector<1x96x64xbf16> to vector<96x64xbf16>
    %cst_47 = arith.constant dense<0.000000e+00> : vector<10x64xf32>
    %60 = tpu.matmul %57, %59, %cst_47 {dimension_numbers = #tpu.dot_dimension_numbers<[1], [0], [0], [1], [0, 0, 1, 1], [], []>} : vector<10x96xbf16>, vector<96x64xbf16>, vector<10x64xf32> -> vector<10x64xf32>
    %61 = arith.addf %55, %60 : vector<10x64xf32>
    %c2_48 = arith.constant 2 : index
    %c0_49 = arith.constant 0 : index
    %62 = tpu.strided_load %arg15[%c2_48, %c0_49] {strides = array<i32: 2, 1>} : memref<24x96xf32, #tpu.memory_space<vmem>>, vector<10x96xf32>
    %63 = arith.truncf %62 : vector<10x96xf32> to vector<10x96xbf16>
    %c2_50 = arith.constant 2 : index
    %c0_51 = arith.constant 0 : index
    %c0_52 = arith.constant 0 : index
    %64 = vector.load %arg3[%c2_50, %c0_51, %c0_52] : memref<5x96x64xbf16, #tpu.memory_space<vmem>>, vector<1x96x64xbf16>
    %65 = vector.shape_cast %64 : vector<1x96x64xbf16> to vector<96x64xbf16>
    %cst_53 = arith.constant dense<0.000000e+00> : vector<10x64xf32>
    %66 = tpu.matmul %63, %65, %cst_53 {dimension_numbers = #tpu.dot_dimension_numbers<[1], [0], [0], [1], [0, 0, 1, 1], [], []>} : vector<10x96xbf16>, vector<96x64xbf16>, vector<10x64xf32> -> vector<10x64xf32>
    %67 = arith.addf %61, %66 : vector<10x64xf32>
    %c3_54 = arith.constant 3 : index
    %c0_55 = arith.constant 0 : index
    %68 = tpu.strided_load %arg15[%c3_54, %c0_55] {strides = array<i32: 2, 1>} : memref<24x96xf32, #tpu.memory_space<vmem>>, vector<10x96xf32>
    %69 = arith.truncf %68 : vector<10x96xf32> to vector<10x96xbf16>
    %c3_56 = arith.constant 3 : index
    %c0_57 = arith.constant 0 : index
    %c0_58 = arith.constant 0 : index
    %70 = vector.load %arg3[%c3_56, %c0_57, %c0_58] : memref<5x96x64xbf16, #tpu.memory_space<vmem>>, vector<1x96x64xbf16>
    %71 = vector.shape_cast %70 : vector<1x96x64xbf16> to vector<96x64xbf16>
    %cst_59 = arith.constant dense<0.000000e+00> : vector<10x64xf32>
    %72 = tpu.matmul %69, %71, %cst_59 {dimension_numbers = #tpu.dot_dimension_numbers<[1], [0], [0], [1], [0, 0, 1, 1], [], []>} : vector<10x96xbf16>, vector<96x64xbf16>, vector<10x64xf32> -> vector<10x64xf32>
    %73 = arith.addf %67, %72 : vector<10x64xf32>
    %c4_60 = arith.constant 4 : index
    %c0_61 = arith.constant 0 : index
    %74 = tpu.strided_load %arg15[%c4_60, %c0_61] {strides = array<i32: 2, 1>} : memref<24x96xf32, #tpu.memory_space<vmem>>, vector<10x96xf32>
    %75 = arith.truncf %74 : vector<10x96xf32> to vector<10x96xbf16>
    %c4_62 = arith.constant 4 : index
    %c0_63 = arith.constant 0 : index
    %c0_64 = arith.constant 0 : index
    %76 = vector.load %arg3[%c4_62, %c0_63, %c0_64] : memref<5x96x64xbf16, #tpu.memory_space<vmem>>, vector<1x96x64xbf16>
    %77 = vector.shape_cast %76 : vector<1x96x64xbf16> to vector<96x64xbf16>
    %cst_65 = arith.constant dense<0.000000e+00> : vector<10x64xf32>
    %78 = tpu.matmul %75, %77, %cst_65 {dimension_numbers = #tpu.dot_dimension_numbers<[1], [0], [0], [1], [0, 0, 1, 1], [], []>} : vector<10x96xbf16>, vector<96x64xbf16>, vector<10x64xf32> -> vector<10x64xf32>
    %79 = arith.addf %73, %78 : vector<10x64xf32>
    %80 = vector.extract_strided_slice %79 {offsets = [0, 0], sizes = [4, 64], strides = [1, 1]} : vector<10x64xf32> to vector<4x64xf32>
    %81 = vector.extract_strided_slice %79 {offsets = [6, 0], sizes = [4, 64], strides = [1, 1]} : vector<10x64xf32> to vector<4x64xf32>
    %82 = tpu.concatenate %80, %81 in 0 : vector<4x64xf32>, vector<4x64xf32> -> vector<8x64xf32>
    %cst_66 = arith.constant dense<0.000000e+00> : vector<64xf32>
    %83 = vector.multi_reduction <add>, %82, %cst_66 [0] : vector<8x64xf32> to vector<64xf32>
    %84 = vector.shape_cast %83 : vector<64xf32> to vector<1x64xf32>
    %85 = vector.extract_strided_slice %84 {offsets = [0, 0], sizes = [1, 16], strides = [1, 1]} : vector<1x64xf32> to vector<1x16xf32>
    %86 = vector.extract_strided_slice %84 {offsets = [0, 16], sizes = [1, 16], strides = [1, 1]} : vector<1x64xf32> to vector<1x16xf32>
    %87 = arith.addf %85, %86 : vector<1x16xf32>
    %88 = vector.extract_strided_slice %84 {offsets = [0, 32], sizes = [1, 16], strides = [1, 1]} : vector<1x64xf32> to vector<1x16xf32>
    %89 = arith.addf %87, %88 : vector<1x16xf32>
    %90 = vector.extract_strided_slice %84 {offsets = [0, 48], sizes = [1, 16], strides = [1, 1]} : vector<1x64xf32> to vector<1x16xf32>
    %91 = arith.addf %89, %90 : vector<1x16xf32>
    %cst_67 = arith.constant 3.125000e-02 : f32
    %92 = vector.broadcast %cst_67 : f32 to vector<1x16xf32>
    %93 = arith.mulf %91, %92 : vector<1x16xf32>
    %94 = tpu.concatenate %93, %93, %93, %93 in 1 : vector<1x16xf32>, vector<1x16xf32>, vector<1x16xf32>, vector<1x16xf32> -> vector<1x64xf32>
    %95 = vector.broadcast %94 : vector<1x64xf32> to vector<8x64xf32>
    %96 = arith.subf %82, %95 : vector<8x64xf32>
    %97 = arith.mulf %96, %96 : vector<8x64xf32>
    %cst_68 = arith.constant dense<0.000000e+00> : vector<64xf32>
    %98 = vector.multi_reduction <add>, %97, %cst_68 [0] : vector<8x64xf32> to vector<64xf32>
    %99 = vector.shape_cast %98 : vector<64xf32> to vector<1x64xf32>
    %100 = vector.extract_strided_slice %99 {offsets = [0, 0], sizes = [1, 16], strides = [1, 1]} : vector<1x64xf32> to vector<1x16xf32>
    %101 = vector.extract_strided_slice %99 {offsets = [0, 16], sizes = [1, 16], strides = [1, 1]} : vector<1x64xf32> to vector<1x16xf32>
    %102 = arith.addf %100, %101 : vector<1x16xf32>
    %103 = vector.extract_strided_slice %99 {offsets = [0, 32], sizes = [1, 16], strides = [1, 1]} : vector<1x64xf32> to vector<1x16xf32>
    %104 = arith.addf %102, %103 : vector<1x16xf32>
    %105 = vector.extract_strided_slice %99 {offsets = [0, 48], sizes = [1, 16], strides = [1, 1]} : vector<1x64xf32> to vector<1x16xf32>
    %106 = arith.addf %104, %105 : vector<1x16xf32>
    %cst_69 = arith.constant 3.125000e-02 : f32
    %107 = vector.broadcast %cst_69 : f32 to vector<1x16xf32>
    %108 = arith.mulf %106, %107 : vector<1x16xf32>
    %c0_70 = arith.constant 0 : index
    %c0_71 = arith.constant 0 : index
    %109 = vector.load %arg4[%c0_70, %c0_71] : memref<1x16xf32, #tpu.memory_space<vmem>>, vector<1x16xf32>
    %cst_72 = arith.constant 9.99999974E-6 : f32
    %110 = vector.broadcast %cst_72 : f32 to vector<1x16xf32>
    %111 = arith.addf %108, %110 : vector<1x16xf32>
    %112 = math.rsqrt %111 : vector<1x16xf32>
    %113 = arith.mulf %109, %112 : vector<1x16xf32>
    %c0_73 = arith.constant 0 : index
    %c0_74 = arith.constant 0 : index
    %114 = vector.load %arg5[%c0_73, %c0_74] : memref<1x16xf32, #tpu.memory_space<vmem>>, vector<1x16xf32>
    %115 = tpu.concatenate %113, %113, %113, %113 in 1 : vector<1x16xf32>, vector<1x16xf32>, vector<1x16xf32>, vector<1x16xf32> -> vector<1x64xf32>
    %116 = vector.broadcast %115 : vector<1x64xf32> to vector<8x64xf32>
    %117 = arith.mulf %96, %116 : vector<8x64xf32>
    %118 = tpu.concatenate %114, %114, %114, %114 in 1 : vector<1x16xf32>, vector<1x16xf32>, vector<1x16xf32>, vector<1x16xf32> -> vector<1x64xf32>
    %119 = vector.broadcast %118 : vector<1x64xf32> to vector<8x64xf32>
    %120 = arith.addf %117, %119 : vector<8x64xf32>
    %cst_75 = arith.constant 2.000000e-01 : f32
    %121 = vector.broadcast %cst_75 : f32 to vector<8x64xf32>
    %122 = arith.mulf %121, %120 : vector<8x64xf32>
    %123 = arith.maximumf %120, %122 : vector<8x64xf32>
    %cst_76 = arith.constant 0.000000e+00 : f32
    %124 = vector.broadcast %cst_76 : f32 to vector<16x128xf32>
    %c0_77 = arith.constant 0 : index
    %c0_78 = arith.constant 0 : index
    %125 = vector.load %arg16[%c0_77, %c0_78] : memref<16x128xf32, #tpu.memory_space<vmem>>, vector<16x128xf32>
    tpu.vector_store %arg16[%c0_77, %c0_78], %124 {strides = array<i32>} : memref<16x128xf32, #tpu.memory_space<vmem>>, vector<16x128xf32>,
    %cst_79 = arith.constant 0.000000e+00 : f32
    %126 = vector.broadcast %cst_79 : f32 to vector<4x32xf32>
    %127 = vector.extract_strided_slice %123 {offsets = [0, 0], sizes = [4, 64], strides = [1, 1]} : vector<8x64xf32> to vector<4x64xf32>
    %128 = tpu.concatenate %126, %127, %126 in 1 : vector<4x32xf32>, vector<4x64xf32>, vector<4x32xf32> -> vector<4x128xf32>
    %c2_80 = arith.constant 2 : index
    %c0_81 = arith.constant 0 : index
    %129 = vector.load %arg16[%c2_80, %c0_81] : memref<16x128xf32, #tpu.memory_space<vmem>>, vector<4x128xf32>
    tpu.vector_store %arg16[%c2_80, %c0_81], %128 {strides = array<i32>} : memref<16x128xf32, #tpu.memory_space<vmem>>, vector<4x128xf32>,
    %130 = vector.extract_strided_slice %123 {offsets = [4, 0], sizes = [4, 64], strides = [1, 1]} : vector<8x64xf32> to vector<4x64xf32>
    %131 = tpu.concatenate %126, %130, %126 in 1 : vector<4x32xf32>, vector<4x64xf32>, vector<4x32xf32> -> vector<4x128xf32>
    %c10 = arith.constant 10 : index
    %c0_82 = arith.constant 0 : index
    %132 = vector.load %arg16[%c10, %c0_82] : memref<16x128xf32, #tpu.memory_space<vmem>>, vector<4x128xf32>
    tpu.vector_store %arg16[%c10, %c0_82], %131 {strides = array<i32>} : memref<16x128xf32, #tpu.memory_space<vmem>>, vector<4x128xf32>,
    %cst_83 = arith.constant 0.000000e+00 : f32
    %133 = vector.broadcast %cst_83 : f32 to vector<6x64xf32>
    %c0_84 = arith.constant 0 : index
    %c0_85 = arith.constant 0 : index
    %134 = tpu.strided_load %arg16[%c0_84, %c0_85] {strides = array<i32: 2, 1>} : memref<16x128xf32, #tpu.memory_space<vmem>>, vector<6x128xf32>
    %135 = arith.truncf %134 : vector<6x128xf32> to vector<6x128xbf16>
    %c0_86 = arith.constant 0 : index
    %c0_87 = arith.constant 0 : index
    %c0_88 = arith.constant 0 : index
    %136 = vector.load %arg6[%c0_86, %c0_87, %c0_88] : memref<5x128x64xbf16, #tpu.memory_space<vmem>>, vector<1x128x64xbf16>
    %137 = vector.shape_cast %136 : vector<1x128x64xbf16> to vector<128x64xbf16>
    %cst_89 = arith.constant dense<0.000000e+00> : vector<6x64xf32>
    %138 = tpu.matmul %135, %137, %cst_89 {dimension_numbers = #tpu.dot_dimension_numbers<[1], [0], [0], [1], [0, 0, 1, 1], [], []>} : vector<6x128xbf16>, vector<128x64xbf16>, vector<6x64xf32> -> vector<6x64xf32>
    %139 = arith.addf %133, %138 : vector<6x64xf32>
    %c1_90 = arith.constant 1 : index
    %c0_91 = arith.constant 0 : index
    %140 = tpu.strided_load %arg16[%c1_90, %c0_91] {strides = array<i32: 2, 1>} : memref<16x128xf32, #tpu.memory_space<vmem>>, vector<6x128xf32>
    %141 = arith.truncf %140 : vector<6x128xf32> to vector<6x128xbf16>
    %c1_92 = arith.constant 1 : index
    %c0_93 = arith.constant 0 : index
    %c0_94 = arith.constant 0 : index
    %142 = vector.load %arg6[%c1_92, %c0_93, %c0_94] : memref<5x128x64xbf16, #tpu.memory_space<vmem>>, vector<1x128x64xbf16>
    %143 = vector.shape_cast %142 : vector<1x128x64xbf16> to vector<128x64xbf16>
    %cst_95 = arith.constant dense<0.000000e+00> : vector<6x64xf32>
    %144 = tpu.matmul %141, %143, %cst_95 {dimension_numbers = #tpu.dot_dimension_numbers<[1], [0], [0], [1], [0, 0, 1, 1], [], []>} : vector<6x128xbf16>, vector<128x64xbf16>, vector<6x64xf32> -> vector<6x64xf32>
    %145 = arith.addf %139, %144 : vector<6x64xf32>
    %c2_96 = arith.constant 2 : index
    %c0_97 = arith.constant 0 : index
    %146 = tpu.strided_load %arg16[%c2_96, %c0_97] {strides = array<i32: 2, 1>} : memref<16x128xf32, #tpu.memory_space<vmem>>, vector<6x128xf32>
    %147 = arith.truncf %146 : vector<6x128xf32> to vector<6x128xbf16>
    %c2_98 = arith.constant 2 : index
    %c0_99 = arith.constant 0 : index
    %c0_100 = arith.constant 0 : index
    %148 = vector.load %arg6[%c2_98, %c0_99, %c0_100] : memref<5x128x64xbf16, #tpu.memory_space<vmem>>, vector<1x128x64xbf16>
    %149 = vector.shape_cast %148 : vector<1x128x64xbf16> to vector<128x64xbf16>
    %cst_101 = arith.constant dense<0.000000e+00> : vector<6x64xf32>
    %150 = tpu.matmul %147, %149, %cst_101 {dimension_numbers = #tpu.dot_dimension_numbers<[1], [0], [0], [1], [0, 0, 1, 1], [], []>} : vector<6x128xbf16>, vector<128x64xbf16>, vector<6x64xf32> -> vector<6x64xf32>
    %151 = arith.addf %145, %150 : vector<6x64xf32>
    %c3_102 = arith.constant 3 : index
    %c0_103 = arith.constant 0 : index
    %152 = tpu.strided_load %arg16[%c3_102, %c0_103] {strides = array<i32: 2, 1>} : memref<16x128xf32, #tpu.memory_space<vmem>>, vector<6x128xf32>
    %153 = arith.truncf %152 : vector<6x128xf32> to vector<6x128xbf16>
    %c3_104 = arith.constant 3 : index
    %c0_105 = arith.constant 0 : index
    %c0_106 = arith.constant 0 : index
    %154 = vector.load %arg6[%c3_104, %c0_105, %c0_106] : memref<5x128x64xbf16, #tpu.memory_space<vmem>>, vector<1x128x64xbf16>
    %155 = vector.shape_cast %154 : vector<1x128x64xbf16> to vector<128x64xbf16>
    %cst_107 = arith.constant dense<0.000000e+00> : vector<6x64xf32>
    %156 = tpu.matmul %153, %155, %cst_107 {dimension_numbers = #tpu.dot_dimension_numbers<[1], [0], [0], [1], [0, 0, 1, 1], [], []>} : vector<6x128xbf16>, vector<128x64xbf16>, vector<6x64xf32> -> vector<6x64xf32>
    %157 = arith.addf %151, %156 : vector<6x64xf32>
    %c4_108 = arith.constant 4 : index
    %c0_109 = arith.constant 0 : index
    %158 = tpu.strided_load %arg16[%c4_108, %c0_109] {strides = array<i32: 2, 1>} : memref<16x128xf32, #tpu.memory_space<vmem>>, vector<6x128xf32>
    %159 = arith.truncf %158 : vector<6x128xf32> to vector<6x128xbf16>
    %c4_110 = arith.constant 4 : index
    %c0_111 = arith.constant 0 : index
    %c0_112 = arith.constant 0 : index
    %160 = vector.load %arg6[%c4_110, %c0_111, %c0_112] : memref<5x128x64xbf16, #tpu.memory_space<vmem>>, vector<1x128x64xbf16>
    %161 = vector.shape_cast %160 : vector<1x128x64xbf16> to vector<128x64xbf16>
    %cst_113 = arith.constant dense<0.000000e+00> : vector<6x64xf32>
    %162 = tpu.matmul %159, %161, %cst_113 {dimension_numbers = #tpu.dot_dimension_numbers<[1], [0], [0], [1], [0, 0, 1, 1], [], []>} : vector<6x128xbf16>, vector<128x64xbf16>, vector<6x64xf32> -> vector<6x64xf32>
    %163 = arith.addf %157, %162 : vector<6x64xf32>
    %164 = vector.extract_strided_slice %163 {offsets = [0, 0], sizes = [2, 64], strides = [1, 1]} : vector<6x64xf32> to vector<2x64xf32>
    %165 = vector.extract_strided_slice %163 {offsets = [4, 0], sizes = [2, 64], strides = [1, 1]} : vector<6x64xf32> to vector<2x64xf32>
    %166 = tpu.concatenate %164, %165 in 0 : vector<2x64xf32>, vector<2x64xf32> -> vector<4x64xf32>
    %cst_114 = arith.constant dense<0.000000e+00> : vector<64xf32>
    %167 = vector.multi_reduction <add>, %166, %cst_114 [0] : vector<4x64xf32> to vector<64xf32>
    %168 = vector.shape_cast %167 : vector<64xf32> to vector<1x64xf32>
    %169 = vector.extract_strided_slice %168 {offsets = [0, 0], sizes = [1, 32], strides = [1, 1]} : vector<1x64xf32> to vector<1x32xf32>
    %170 = vector.extract_strided_slice %168 {offsets = [0, 32], sizes = [1, 32], strides = [1, 1]} : vector<1x64xf32> to vector<1x32xf32>
    %171 = arith.addf %169, %170 : vector<1x32xf32>
    %cst_115 = arith.constant 1.250000e-01 : f32
    %172 = vector.broadcast %cst_115 : f32 to vector<1x32xf32>
    %173 = arith.mulf %171, %172 : vector<1x32xf32>
    %174 = tpu.concatenate %173, %173 in 1 : vector<1x32xf32>, vector<1x32xf32> -> vector<1x64xf32>
    %175 = vector.broadcast %174 : vector<1x64xf32> to vector<4x64xf32>
    %176 = arith.subf %166, %175 : vector<4x64xf32>
    %177 = arith.mulf %176, %176 : vector<4x64xf32>
    %cst_116 = arith.constant dense<0.000000e+00> : vector<64xf32>
    %178 = vector.multi_reduction <add>, %177, %cst_116 [0] : vector<4x64xf32> to vector<64xf32>
    %179 = vector.shape_cast %178 : vector<64xf32> to vector<1x64xf32>
    %180 = vector.extract_strided_slice %179 {offsets = [0, 0], sizes = [1, 32], strides = [1, 1]} : vector<1x64xf32> to vector<1x32xf32>
    %181 = vector.extract_strided_slice %179 {offsets = [0, 32], sizes = [1, 32], strides = [1, 1]} : vector<1x64xf32> to vector<1x32xf32>
    %182 = arith.addf %180, %181 : vector<1x32xf32>
    %cst_117 = arith.constant 1.250000e-01 : f32
    %183 = vector.broadcast %cst_117 : f32 to vector<1x32xf32>
    %184 = arith.mulf %182, %183 : vector<1x32xf32>
    %c0_118 = arith.constant 0 : index
    %c0_119 = arith.constant 0 : index
    %185 = vector.load %arg7[%c0_118, %c0_119] : memref<1x32xf32, #tpu.memory_space<vmem>>, vector<1x32xf32>
    %cst_120 = arith.constant 9.99999974E-6 : f32
    %186 = vector.broadcast %cst_120 : f32 to vector<1x32xf32>
    %187 = arith.addf %184, %186 : vector<1x32xf32>
    %188 = math.rsqrt %187 : vector<1x32xf32>
    %189 = arith.mulf %185, %188 : vector<1x32xf32>
    %c0_121 = arith.constant 0 : index
    %c0_122 = arith.constant 0 : index
    %190 = vector.load %arg8[%c0_121, %c0_122] : memref<1x32xf32, #tpu.memory_space<vmem>>, vector<1x32xf32>
    %191 = tpu.concatenate %189, %189 in 1 : vector<1x32xf32>, vector<1x32xf32> -> vector<1x64xf32>
    %192 = vector.broadcast %191 : vector<1x64xf32> to vector<4x64xf32>
    %193 = arith.mulf %176, %192 : vector<4x64xf32>
    %194 = tpu.concatenate %190, %190 in 1 : vector<1x32xf32>, vector<1x32xf32> -> vector<1x64xf32>
    %195 = vector.broadcast %194 : vector<1x64xf32> to vector<4x64xf32>
    %196 = arith.addf %193, %195 : vector<4x64xf32>
    %cst_123 = arith.constant 2.000000e-01 : f32
    %197 = vector.broadcast %cst_123 : f32 to vector<4x64xf32>
    %198 = arith.mulf %197, %196 : vector<4x64xf32>
    %199 = arith.maximumf %196, %198 : vector<4x64xf32>
    %cst_124 = arith.constant 0.000000e+00 : f32
    %200 = vector.broadcast %cst_124 : f32 to vector<12x192xf32>
    %c0_125 = arith.constant 0 : index
    %c0_126 = arith.constant 0 : index
    %201 = vector.load %arg17[%c0_125, %c0_126] : memref<12x192xf32, #tpu.memory_space<vmem>>, vector<12x192xf32>
    tpu.vector_store %arg17[%c0_125, %c0_126], %200 {strides = array<i32>} : memref<12x192xf32, #tpu.memory_space<vmem>>, vector<12x192xf32>,
    %cst_127 = arith.constant 0.000000e+00 : f32
    %202 = vector.broadcast %cst_127 : f32 to vector<2x64xf32>
    %203 = vector.extract_strided_slice %199 {offsets = [0, 0], sizes = [2, 64], strides = [1, 1]} : vector<4x64xf32> to vector<2x64xf32>
    %204 = tpu.concatenate %202, %203, %202 in 1 : vector<2x64xf32>, vector<2x64xf32>, vector<2x64xf32> -> vector<2x192xf32>
    %c2_128 = arith.constant 2 : index
    %c0_129 = arith.constant 0 : index
    %205 = vector.load %arg17[%c2_128, %c0_129] : memref<12x192xf32, #tpu.memory_space<vmem>>, vector<2x192xf32>
    tpu.vector_store %arg17[%c2_128, %c0_129], %204 {strides = array<i32>} : memref<12x192xf32, #tpu.memory_space<vmem>>, vector<2x192xf32>,
    %206 = vector.extract_strided_slice %199 {offsets = [2, 0], sizes = [2, 64], strides = [1, 1]} : vector<4x64xf32> to vector<2x64xf32>
    %207 = tpu.concatenate %202, %206, %202 in 1 : vector<2x64xf32>, vector<2x64xf32>, vector<2x64xf32> -> vector<2x192xf32>
    %c8 = arith.constant 8 : index
    %c0_130 = arith.constant 0 : index
    %208 = vector.load %arg17[%c8, %c0_130] : memref<12x192xf32, #tpu.memory_space<vmem>>, vector<2x192xf32>
    tpu.vector_store %arg17[%c8, %c0_130], %207 {strides = array<i32>} : memref<12x192xf32, #tpu.memory_space<vmem>>, vector<2x192xf32>,
    %cst_131 = arith.constant 0.000000e+00 : f32
    %209 = vector.broadcast %cst_131 : f32 to vector<8x128xf32>
    %c0_132 = arith.constant 0 : index
    %c0_133 = arith.constant 0 : index
    %210 = vector.load %arg17[%c0_132, %c0_133] : memref<12x192xf32, #tpu.memory_space<vmem>>, vector<8x192xf32>
    %211 = arith.truncf %210 : vector<8x192xf32> to vector<8x192xbf16>
    %c0_134 = arith.constant 0 : index
    %c0_135 = arith.constant 0 : index
    %c0_136 = arith.constant 0 : index
    %212 = vector.load %arg9[%c0_134, %c0_135, %c0_136] : memref<5x192x128xbf16, #tpu.memory_space<vmem>>, vector<1x192x128xbf16>
    %213 = vector.shape_cast %212 : vector<1x192x128xbf16> to vector<192x128xbf16>
    %cst_137 = arith.constant dense<0.000000e+00> : vector<8x128xf32>
    %214 = tpu.matmul %211, %213, %cst_137 {dimension_numbers = #tpu.dot_dimension_numbers<[1], [0], [0], [1], [0, 0, 1, 1], [], []>} : vector<8x192xbf16>, vector<192x128xbf16>, vector<8x128xf32> -> vector<8x128xf32>
    %215 = arith.addf %209, %214 : vector<8x128xf32>
    %c1_138 = arith.constant 1 : index
    %c0_139 = arith.constant 0 : index
    %216 = vector.load %arg17[%c1_138, %c0_139] : memref<12x192xf32, #tpu.memory_space<vmem>>, vector<8x192xf32>
    %217 = arith.truncf %216 : vector<8x192xf32> to vector<8x192xbf16>
    %c1_140 = arith.constant 1 : index
    %c0_141 = arith.constant 0 : index
    %c0_142 = arith.constant 0 : index
    %218 = vector.load %arg9[%c1_140, %c0_141, %c0_142] : memref<5x192x128xbf16, #tpu.memory_space<vmem>>, vector<1x192x128xbf16>
    %219 = vector.shape_cast %218 : vector<1x192x128xbf16> to vector<192x128xbf16>
    %cst_143 = arith.constant dense<0.000000e+00> : vector<8x128xf32>
    %220 = tpu.matmul %217, %219, %cst_143 {dimension_numbers = #tpu.dot_dimension_numbers<[1], [0], [0], [1], [0, 0, 1, 1], [], []>} : vector<8x192xbf16>, vector<192x128xbf16>, vector<8x128xf32> -> vector<8x128xf32>
    %221 = arith.addf %215, %220 : vector<8x128xf32>
    %c2_144 = arith.constant 2 : index
    %c0_145 = arith.constant 0 : index
    %222 = vector.load %arg17[%c2_144, %c0_145] : memref<12x192xf32, #tpu.memory_space<vmem>>, vector<8x192xf32>
    %223 = arith.truncf %222 : vector<8x192xf32> to vector<8x192xbf16>
    %c2_146 = arith.constant 2 : index
    %c0_147 = arith.constant 0 : index
    %c0_148 = arith.constant 0 : index
    %224 = vector.load %arg9[%c2_146, %c0_147, %c0_148] : memref<5x192x128xbf16, #tpu.memory_space<vmem>>, vector<1x192x128xbf16>
    %225 = vector.shape_cast %224 : vector<1x192x128xbf16> to vector<192x128xbf16>
    %cst_149 = arith.constant dense<0.000000e+00> : vector<8x128xf32>
    %226 = tpu.matmul %223, %225, %cst_149 {dimension_numbers = #tpu.dot_dimension_numbers<[1], [0], [0], [1], [0, 0, 1, 1], [], []>} : vector<8x192xbf16>, vector<192x128xbf16>, vector<8x128xf32> -> vector<8x128xf32>
    %227 = arith.addf %221, %226 : vector<8x128xf32>
    %c3_150 = arith.constant 3 : index
    %c0_151 = arith.constant 0 : index
    %228 = vector.load %arg17[%c3_150, %c0_151] : memref<12x192xf32, #tpu.memory_space<vmem>>, vector<8x192xf32>
    %229 = arith.truncf %228 : vector<8x192xf32> to vector<8x192xbf16>
    %c3_152 = arith.constant 3 : index
    %c0_153 = arith.constant 0 : index
    %c0_154 = arith.constant 0 : index
    %230 = vector.load %arg9[%c3_152, %c0_153, %c0_154] : memref<5x192x128xbf16, #tpu.memory_space<vmem>>, vector<1x192x128xbf16>
    %231 = vector.shape_cast %230 : vector<1x192x128xbf16> to vector<192x128xbf16>
    %cst_155 = arith.constant dense<0.000000e+00> : vector<8x128xf32>
    %232 = tpu.matmul %229, %231, %cst_155 {dimension_numbers = #tpu.dot_dimension_numbers<[1], [0], [0], [1], [0, 0, 1, 1], [], []>} : vector<8x192xbf16>, vector<192x128xbf16>, vector<8x128xf32> -> vector<8x128xf32>
    %233 = arith.addf %227, %232 : vector<8x128xf32>
    %c4_156 = arith.constant 4 : index
    %c0_157 = arith.constant 0 : index
    %234 = vector.load %arg17[%c4_156, %c0_157] : memref<12x192xf32, #tpu.memory_space<vmem>>, vector<8x192xf32>
    %235 = arith.truncf %234 : vector<8x192xf32> to vector<8x192xbf16>
    %c4_158 = arith.constant 4 : index
    %c0_159 = arith.constant 0 : index
    %c0_160 = arith.constant 0 : index
    %236 = vector.load %arg9[%c4_158, %c0_159, %c0_160] : memref<5x192x128xbf16, #tpu.memory_space<vmem>>, vector<1x192x128xbf16>
    %237 = vector.shape_cast %236 : vector<1x192x128xbf16> to vector<192x128xbf16>
    %cst_161 = arith.constant dense<0.000000e+00> : vector<8x128xf32>
    %238 = tpu.matmul %235, %237, %cst_161 {dimension_numbers = #tpu.dot_dimension_numbers<[1], [0], [0], [1], [0, 0, 1, 1], [], []>} : vector<8x192xbf16>, vector<192x128xbf16>, vector<8x128xf32> -> vector<8x128xf32>
    %239 = arith.addf %233, %238 : vector<8x128xf32>
    %240 = vector.extract_strided_slice %239 {offsets = [0, 0], sizes = [2, 128], strides = [1, 1]} : vector<8x128xf32> to vector<2x128xf32>
    %241 = vector.extract_strided_slice %239 {offsets = [6, 0], sizes = [2, 128], strides = [1, 1]} : vector<8x128xf32> to vector<2x128xf32>
    %242 = tpu.concatenate %240, %241 in 0 : vector<2x128xf32>, vector<2x128xf32> -> vector<4x128xf32>
    %cst_162 = arith.constant dense<0.000000e+00> : vector<128xf32>
    %243 = vector.multi_reduction <add>, %242, %cst_162 [0] : vector<4x128xf32> to vector<128xf32>
    %244 = vector.shape_cast %243 : vector<128xf32> to vector<1x128xf32>
    %245 = vector.extract_strided_slice %244 {offsets = [0, 0], sizes = [1, 64], strides = [1, 1]} : vector<1x128xf32> to vector<1x64xf32>
    %246 = vector.extract_strided_slice %244 {offsets = [0, 64], sizes = [1, 64], strides = [1, 1]} : vector<1x128xf32> to vector<1x64xf32>
    %247 = arith.addf %245, %246 : vector<1x64xf32>
    %cst_163 = arith.constant 1.250000e-01 : f32
    %248 = vector.broadcast %cst_163 : f32 to vector<1x64xf32>
    %249 = arith.mulf %247, %248 : vector<1x64xf32>
    %250 = tpu.concatenate %249, %249 in 1 : vector<1x64xf32>, vector<1x64xf32> -> vector<1x128xf32>
    %251 = vector.broadcast %250 : vector<1x128xf32> to vector<4x128xf32>
    %252 = arith.subf %242, %251 : vector<4x128xf32>
    %253 = arith.mulf %252, %252 : vector<4x128xf32>
    %cst_164 = arith.constant dense<0.000000e+00> : vector<128xf32>
    %254 = vector.multi_reduction <add>, %253, %cst_164 [0] : vector<4x128xf32> to vector<128xf32>
    %255 = vector.shape_cast %254 : vector<128xf32> to vector<1x128xf32>
    %256 = vector.extract_strided_slice %255 {offsets = [0, 0], sizes = [1, 64], strides = [1, 1]} : vector<1x128xf32> to vector<1x64xf32>
    %257 = vector.extract_strided_slice %255 {offsets = [0, 64], sizes = [1, 64], strides = [1, 1]} : vector<1x128xf32> to vector<1x64xf32>
    %258 = arith.addf %256, %257 : vector<1x64xf32>
    %cst_165 = arith.constant 1.250000e-01 : f32
    %259 = vector.broadcast %cst_165 : f32 to vector<1x64xf32>
    %260 = arith.mulf %258, %259 : vector<1x64xf32>
    %c0_166 = arith.constant 0 : index
    %c0_167 = arith.constant 0 : index
    %261 = vector.load %arg10[%c0_166, %c0_167] : memref<1x64xf32, #tpu.memory_space<vmem>>, vector<1x64xf32>
    %cst_168 = arith.constant 9.99999974E-6 : f32
    %262 = vector.broadcast %cst_168 : f32 to vector<1x64xf32>
    %263 = arith.addf %260, %262 : vector<1x64xf32>
    %264 = math.rsqrt %263 : vector<1x64xf32>
    %265 = arith.mulf %261, %264 : vector<1x64xf32>
    %c0_169 = arith.constant 0 : index
    %c0_170 = arith.constant 0 : index
    %266 = vector.load %arg11[%c0_169, %c0_170] : memref<1x64xf32, #tpu.memory_space<vmem>>, vector<1x64xf32>
    %267 = tpu.concatenate %265, %265 in 1 : vector<1x64xf32>, vector<1x64xf32> -> vector<1x128xf32>
    %268 = vector.broadcast %267 : vector<1x128xf32> to vector<4x128xf32>
    %269 = arith.mulf %252, %268 : vector<4x128xf32>
    %270 = tpu.concatenate %266, %266 in 1 : vector<1x64xf32>, vector<1x64xf32> -> vector<1x128xf32>
    %271 = vector.broadcast %270 : vector<1x128xf32> to vector<4x128xf32>
    %272 = arith.addf %269, %271 : vector<4x128xf32>
    %cst_171 = arith.constant 2.000000e-01 : f32
    %273 = vector.broadcast %cst_171 : f32 to vector<4x128xf32>
    %274 = arith.mulf %273, %272 : vector<4x128xf32>
    %275 = arith.maximumf %272, %274 : vector<4x128xf32>
    %276 = vector.extract_strided_slice %275 {offsets = [0, 0], sizes = [1, 128], strides = [1, 1]} : vector<4x128xf32> to vector<1x128xf32>
    %277 = vector.extract_strided_slice %275 {offsets = [1, 0], sizes = [1, 128], strides = [1, 1]} : vector<4x128xf32> to vector<1x128xf32>
    %278 = tpu.concatenate %276, %277 in 1 : vector<1x128xf32>, vector<1x128xf32> -> vector<1x256xf32>
    %279 = vector.extract_strided_slice %275 {offsets = [2, 0], sizes = [1, 128], strides = [1, 1]} : vector<4x128xf32> to vector<1x128xf32>
    %280 = vector.extract_strided_slice %275 {offsets = [3, 0], sizes = [1, 128], strides = [1, 1]} : vector<4x128xf32> to vector<1x128xf32>
    %281 = tpu.concatenate %279, %280 in 1 : vector<1x128xf32>, vector<1x128xf32> -> vector<1x256xf32>
    %282 = tpu.concatenate %278, %281 in 0 : vector<1x256xf32>, vector<1x256xf32> -> vector<2x256xf32>
    %283 = arith.truncf %282 : vector<2x256xf32> to vector<2x256xbf16>
    %c0_172 = arith.constant 0 : index
    %c0_173 = arith.constant 0 : index
    %284 = vector.load %arg12[%c0_172, %c0_173] : memref<256x9xbf16, #tpu.memory_space<vmem>>, vector<256x9xbf16>
    %cst_174 = arith.constant dense<0.000000e+00> : vector<2x9xf32>
    %285 = tpu.matmul %283, %284, %cst_174 {dimension_numbers = #tpu.dot_dimension_numbers<[1], [0], [0], [1], [0, 0, 1, 1], [], []>} : vector<2x256xbf16>, vector<256x9xbf16>, vector<2x9xf32> -> vector<2x9xf32>
    %c0_175 = arith.constant 0 : index
    %c0_176 = arith.constant 0 : index
    %286 = vector.load %arg13[%c0_175, %c0_176] : memref<1x9xf32, #tpu.memory_space<vmem>>, vector<1x9xf32>
    %287 = vector.broadcast %286 : vector<1x9xf32> to vector<2x9xf32>
    %288 = arith.addf %285, %287 : vector<2x9xf32>
    %c0_177 = arith.constant 0 : index
    %c0_178 = arith.constant 0 : index
    %289 = vector.load %arg14[%c0_177, %c0_178] : memref<2x9xf32, #tpu.memory_space<vmem>>, vector<2x9xf32>
    tpu.vector_store %arg14[%c0_177, %c0_178], %288 {strides = array<i32>} : memref<2x9xf32, #tpu.memory_space<vmem>>, vector<2x9xf32>,
    return
  }
}

</mosaic_0001>

<bundles_post_ra>
// kernel: forward.1
= control target key start
LH: loop header
LB: loop body
LE: loop exit
PB: predicated region body
PF: predicated region fallthrough
CT: control target
= control target key end

     0   :  { %vm114_vm0 = vcmask 654336   ;;  %vm591_vm1 = vcmask 785408   ;;  %v4000_v50 = vmov 0.0   ;;  %vm573_vm2 = vcmask 1045504   ;;  %s4002_s18 = smov 16   ;;  %s4004_s19 = smov 112   ;;  %s4967_s1 = inlined_call_operand.vmem [shape: bf16[5,80,64], index: 1, kind: input, shape index: {}]   ;;  %s4968_s0 = inlined_call_operand.vmem [shape: f32[40,80], index: 0, kind: input, shape index: {}]   ;;  %s4969_s3 = inlined_call_operand.vmem [shape: bf16[5,96,64], index: 3, kind: input, shape index: {}]   ;;  %s4970_s2 = inlined_call_operand.vmem [shape: f32[1,64], index: 2, kind: input, shape index: {}]   ;;  %s4971_s5 = inlined_call_operand.vmem [shape: f32[1,16], index: 5, kind: input, shape index: {}]   ;;  %s4972_s4 = inlined_call_operand.vmem [shape: f32[1,16], index: 4, kind: input, shape index: {}]   ;;  %s4973_s6 = inlined_call_operand.vmem [shape: bf16[5,128,64], index: 6, kind: input, shape index: {}]   ;;  %s4974_s8 = inlined_call_operand.vmem [shape: f32[1,32], index: 8, kind: input, shape index: {}]   ;;  %s4975_s7 = inlined_call_operand.vmem [shape: f32[1,32], index: 7, kind: input, shape index: {}]   ;;  %s4976_s9 = inlined_call_operand.vmem [shape: bf16[5,192,128], index: 9, kind: input, shape index: {}]   ;;  %s4977_s11 = inlined_call_operand.vmem [shape: f32[1,64], index: 11, kind: input, shape index: {}]   ;;  %s4978_s12 = inlined_call_operand.vmem [shape: bf16[256,9], index: 12, kind: input, shape index: {}]   ;;  %s4979_s10 = inlined_call_operand.vmem [shape: f32[1,64], index: 10, kind: input, shape index: {}]   ;;  %s4980_s13 = inlined_call_operand.vmem [shape: f32[1,9], index: 13, kind: input, shape index: {}]   ;;  %s4981_s14 = inlined_call_operand.vmem [shape: f32[2,9], index: 14, kind: output, shape index: {}]  }
   0x1   :  { %v3822_v0 = vld [vmem:[%s4967_s1 + $0x28] sm:$0xff]   ;;  %v3823_v1 = vld [vmem:[%s4967_s1] sm:$0xff]   ;;  %v3824_v2 = vld [vmem:[%s4967_s1 + $0x30] sm:$0xff]   ;;  %1227 = vst [vmem:[#allocation3] sm:$0xff] %v4000_v50  ;;  %vm4001_vm3 = vmmov 0   ;;  %vm599_vm4 = vcmask 130048  }
   0x2   :  { %3519 = vmatprep.subr.bf16.mxu0 %v3822_v0  ;;  %3533 = vmatprep.subr.bf16.mxu1 %v3823_v1  ;;  %v3825_v3 = vld [vmem:[%s4967_s1 + $0x8] sm:$0xff]   ;;  %v3826_v4 = vld [vmem:[%s4967_s1 + $0x38] sm:$0xff]   ;;  %v3827_v5 = vld [vmem:[%s4967_s1 + $0x10] sm:$0xff]   ;;  %1228 = vst [vmem:[#allocation3 + $0x8] sm:$0xff] %v4000_v50  ;;  %vm1112_vm5 = vcmask 523264   ;;  %vm1110_vm6 = vcmask 1043456  }
   0x3   :  { %3520 = vmatpush3.bf16.msra.mxu0 %v3822_v0  ;;  %3534 = vmatpush3.bf16.msra.mxu1 %v3823_v1  ;;  %v3828_v6 = vld [vmem:[%s4967_s1 + $0x40] sm:$0xff]   ;;  %v3829_v7 = vld [vmem:[%s4967_s1 + $0x18] sm:$0xff]   ;;  %v3830_v13 = vld [vmem:[%s4967_s1 + $0x48] sm:$0xff]   ;;  %1862 = vst [vmem:[#allocation4] sm:$0xff] %v4000_v50  ;;  %s4005_s20 = smov 96   ;;  %s4006_s21 = smov 32  }
   0x4   :  { %3521 = vmatprep.subr.bf16.mxu0 %v3824_v2  ;;  %3535 = vmatprep.subr.bf16.mxu1 %v3825_v3  ;;  %v2929_v8 = vld [vmem:[%s4968_s0 + $0x1] ss:$2 sm:$0xff]  ;;  %v2930_v9 = vld [vmem:[%s4968_s0 + $0x11] ss:$2 sm:$0xff]  ;;  %v48_v10 = vld [vmem:[%s4968_s0] ss:$2 sm:$0xff] }
   0x5   :  { %v71_v11 = vpack.c.bf16 %v2930_v9, %v2929_v8  ;;  %v2927_v12 = vld [vmem:[%s4968_s0 + $0x10] ss:$2 sm:$0xff]  ;;  %v3831_v14 = vld [vmem:[%s4967_s1 + $0x20] sm:$0xff]   ;;  %v3837_v30 = vld [vmem:[%s4967_s1 + $0x88] sm:$0xff]   ;;  %1864 = vst [vmem:[#allocation4 + $0x10] sm:$0xf] %v4000_v50 }
   0x6   :  { %v53_v15 = vpack.c.bf16 %v2927_v12, %v48_v10  ;;  %v2931_v16 = vld [vmem:[%s4968_s0 + $0x21] ss:$2 sm:$0x3]  ;;  %v2928_v17 = vld [vmem:[%s4968_s0 + $0x20] ss:$2 sm:$0x3] }
   0x7   :  { %3522 = vmatpush3.bf16.msra.mxu0 %v3824_v2  ;;  %3536 = vmatpush3.bf16.msra.mxu1 %v3825_v3  ;;  %v3832_v18 = vld [vmem:[%s4967_s1 + $0x50] sm:$0xff]   ;;  %v3833_v19 = vld [vmem:[%s4967_s1 + $0x78] sm:$0xff]   ;;  %v72_v20 = vpack.c.bf16 %v2931_v16, %v2931_v16  ;;  %v54_v21 = vpack.c.bf16 %v2928_v17, %v2928_v17  ;;  %v3835_v23 = vld [vmem:[%s4967_s1 + $0x80] sm:$0xff]   ;;  %592 = vst.msk [vmem:[#allocation2] sm:$0xff] %vm591_vm1, %v4000_v50  ;;  %s4007_s22 = smov 48   ;;  %vm1145_vm7 = vcmask 261120  }
   0x8   :  { %3523 = vmatprep.subr.bf16.mxu0 %v3826_v4  ;;  %3537 = vmatprep.subr.bf16.mxu1 %v3827_v5  ;;  %v3834_v22 = vld [vmem:[%s4967_s1 + $0x58] sm:$0xff]   ;;  %v2956_v24 = vld [vmem:[%s4968_s0 + $0x2] ss:$2 sm:$0xff]  ;;  %v2976_v28 = vld [vmem:[%s4968_s0 + $0x3] ss:$2 sm:$0xff]  ;;  %593 = vst.msk [vmem:[#allocation2 + $0x8] sm:$0xff] %vm591_vm1, %v4000_v50 }
   0x9   :  { %3529 = vmatprep.mubr.msk.bf16.mxu0 %vm114_vm0, %v71_v11  ;;  %3543 = vmatprep.mubr.msk.bf16.mxu1 %vm114_vm0, %v53_v15  ;;  %v2957_v25 = vld [vmem:[%s4968_s0 + $0x12] ss:$2 sm:$0xff]  ;;  %v2977_v29 = vld [vmem:[%s4968_s0 + $0x13] ss:$2 sm:$0xff]  ;;  %v3838_v32 = vld [vmem:[%s4967_s1 + $0x68] sm:$0xff]   ;;  %594 = vst.msk [vmem:[#allocation2 + $0x10] sm:$0xff] %vm591_vm1, %v4000_v50 }
   0xa   :  { %v3836_v26 = vld [vmem:[%s4967_s1 + $0x60] sm:$0xff]   ;;  %v259_v27 = vpack.c.bf16 %v2957_v25, %v2956_v24  ;;  %v365_v31 = vpack.c.bf16 %v2977_v29, %v2976_v28  ;;  %v3839_v33 = vld [vmem:[%s4967_s1 + $0x90] sm:$0xff]   ;;  %v3841_v35 = vld [vmem:[%s4967_s1 + $0x98] sm:$0xff]   ;;  %1863 = vst.msk [vmem:[#allocation4 + $0x8] sm:$0xff] %vm1112_vm5, %v4000_v50  ;;  %vm1147_vm8 = vcmask 392192   ;;  %vm1789_vm9 = vcmask 519168  }
   0xb   :  { %3524 = vmatpush3.bf16.msra.mxu0 %v3826_v4  ;;  %3538 = vmatpush3.bf16.msra.mxu1 %v3827_v5  ;;  %v3840_v34 = vld [vmem:[%s4967_s1 + $0x70] sm:$0xff]   ;;  %v2958_v36 = vld [vmem:[%s4968_s0 + $0x22] ss:$2 sm:$0x3]  ;;  %v3843_v43 = vld [vmem:[%s4967_s1 + $0xa8] sm:$0xff]   ;;  %vm1886_vm10 = vcmask 517120  }
   0xc   :  { %3525 = vmatprep.subr.bf16.mxu0 %v3828_v6  ;;  %3539 = vmatprep.subr.bf16.mxu1 %v3829_v7  ;;  %v3842_v37 = vld [vmem:[%s4967_s1 + $0xa0] sm:$0xff]   ;;  %v260_v41 = vpack.c.bf16 %v2958_v36, %v2958_v36  ;;  %v3844_v45 = vld [vmem:[%s4967_s1 + $0xb0] sm:$0xff]   ;;  %v3845_v46 = vld [vmem:[%s4967_s1 + $0xb8] sm:$0xff]   ;;  %vm1787_vm11 = vcmask 1041408   ;;  %vm1878_vm12 = vcmask 519170   ;;  %vm2741_vm13 = vcmask 1040384  }
   0xd   :  { %v2978_v38 = vld [vmem:[%s4968_s0 + $0x23] ss:$2 sm:$0x3]  ;;  %v2996_v39 = vld [vmem:[%s4968_s0 + $0x4] ss:$2 sm:$0xff]  ;;  %v3850_v54 = vld [vmem:[%s4969_s3 + $0x38] sm:$0xff]  }
   0xe   :  { %v2997_v40 = vld [vmem:[%s4968_s0 + $0x14] ss:$2 sm:$0xff]  ;;  %v366_v42 = vpack.c.bf16 %v2978_v38, %v2978_v38  ;;  %v2998_v48 = vld [vmem:[%s4968_s0 + $0x24] ss:$2 sm:$0x3]  ;;  %v3849_v53 = vld [vmem:[%s4969_s3 + $0x8] sm:$0xff]  }
   0xf   :  { %3526 = vmatpush3.bf16.msra.mxu0 %v3828_v6  ;;  %3540 = vmatpush3.bf16.msra.mxu1 %v3829_v7  ;;  %v471_v44 = vpack.c.bf16 %v2997_v40, %v2996_v39  ;;  %v3846_v47 = vld [vmem:[%s4967_s1 + $0xc0] sm:$0xff]   ;;  %v472_v49 = vpack.c.bf16 %v2998_v48, %v2998_v48  ;;  %v3848_v52 = vld [vmem:[%s4969_s3 + $0x30] sm:$0xff]   ;;  %v3854_v25 = vld [vmem:[%s4969_s3 + $0x48] sm:$0xff]   ;;  %vm2921_vm14 = vcmask 66560  }
  0x10   :  { %3527 = vmatprep.subr.bf16.mxu0 %v3830_v13  ;;  %3541 = vmatprep.subr.bf16.mxu1 %v3831_v14  ;;  %v3847_v51 = vld [vmem:[%s4969_s3] sm:$0xff]   ;;  %v3851_v16 = vld [vmem:[%s4969_s3 + $0x10] sm:$0xff]  }
  0x11   :  { %v3852_v17 = vld [vmem:[%s4969_s3 + $0x40] sm:$0xff]  }
  0x12   :  { %v3855_v29 = vld [vmem:[%s4969_s3 + $0x20] sm:$0xff]  }
  0x13   :  { %3528 = vmatpush3.bf16.msra.mxu0 %v3830_v13  ;;  %3542 = vmatpush3.bf16.msra.mxu1 %v3831_v14 }
  0x14   :  { %3547 = vmatprep.subr.bf16.mxu0 %v3832_v18  ;;  %3561 = vmatprep.subr.bf16.mxu1 %v3833_v19 }
  0x16   :  { %3530 = vmatmul.mubr.msk.bf16.vlgmr.msra.gmra.mrb[0].mxu0 %vm114_vm0, %v72_v20  ;;  %3544 = vmatmul.mubr.msk.bf16.vlgmr.msra.gmra.mrb[0].mxu1 %vm114_vm0, %v54_v21  ;;  %v3016_v21 = vld [vmem:[%s4970_s2] ss:$0 sm:$0xff] }
  0x17   :  { %3548 = vmatpush3.bf16.msra.mxu0 %v3832_v18  ;;  %3562 = vmatpush3.bf16.msra.mxu1 %v3833_v19 }
  0x18   :  { %3549 = vmatprep.subr.bf16.mxu0 %v3834_v22  ;;  %3563 = vmatprep.subr.bf16.mxu1 %v3835_v23 }
  0x19   :  { %3557 = vmatprep.mubr.msk.bf16.mxu0 %vm114_vm0, %v259_v27  ;;  %3571 = vmatprep.mubr.msk.bf16.mxu1 %vm114_vm0, %v365_v31 }
  0x1b   :  { %3550 = vmatpush3.bf16.msra.mxu0 %v3834_v22  ;;  %3564 = vmatpush3.bf16.msra.mxu1 %v3835_v23  ;;  %v3853_v22 = vld [vmem:[%s4969_s3 + $0x18] sm:$0xff]  }
  0x1c   :  { %3551 = vmatprep.subr.bf16.mxu0 %v3836_v26  ;;  %3565 = vmatprep.subr.bf16.mxu1 %v3837_v30 }
  0x1f   :  { %3552 = vmatpush3.bf16.msra.mxu0 %v3836_v26  ;;  %3566 = vmatpush3.bf16.msra.mxu1 %v3837_v30  ;;  %v3856_v30 = vld [vmem:[%s4969_s3 + $0x50] sm:$0xff]  }
  0x20   :  { %3553 = vmatprep.subr.bf16.mxu0 %v3838_v32  ;;  %3567 = vmatprep.subr.bf16.mxu1 %v3839_v33 }
  0x23   :  { %3554 = vmatpush3.bf16.msra.mxu0 %v3838_v32  ;;  %3568 = vmatpush3.bf16.msra.mxu1 %v3839_v33 }
  0x24   :  { %3555 = vmatprep.subr.bf16.mxu0 %v3840_v34  ;;  %3569 = vmatprep.subr.bf16.mxu1 %v3841_v35 }
  0x27   :  { %3556 = vmatpush3.bf16.msra.mxu0 %v3840_v34  ;;  %3570 = vmatpush3.bf16.msra.mxu1 %v3841_v35  ;;  %v3857_v34 = vld [vmem:[%s4969_s3 + $0x28] sm:$0xff]  }
  0x28   :  { %3575 = vmatprep.subr.bf16.mxu0 %v3842_v37  ;;  %3605 = vmatprep.subr.bf16.mxu1 %v4000_v50 }
  0x2a   :  { %3558 = vmatmul.mubr.msk.bf16.vlgmr.msra.gmra.mrb[4].mxu0 %vm114_vm0, %v260_v41  ;;  %3572 = vmatmul.mubr.msk.bf16.vlgmr.msra.gmra.mrb[4].mxu1 %vm114_vm0, %v366_v42 }
  0x2b   :  { %3576 = vmatpush3.bf16.msra.mxu0 %v3842_v37  ;;  %3585 = vmatprep.mubr.msk.bf16.mxu0 %vm114_vm0, %v471_v44  ;;  %v3858_v37 = vld [vmem:[%s4969_s3 + $0x58] sm:$0xff]  }
  0x2c   :  { %3577 = vmatprep.subr.bf16.mxu0 %v3843_v43  ;;  %3606 = vmatpush3.bf16.msra.mxu1 %v3847_v51 }
  0x2d   :  { %3607 = vmatprep.subr.bf16.mxu1 %v4000_v50  ;;  %3617 = vmatprep.mubr.msk.bf16.mxu1 %vm4001_vm3, %v4000_v50 }
  0x2f   :  { %3578 = vmatpush3.bf16.msra.mxu0 %v3843_v43 }
  0x30   :  { %3579 = vmatprep.subr.bf16.mxu0 %v3844_v45  ;;  %3608 = vmatpush3.bf16.msra.mxu1 %v3849_v53  ;;  %v3859_v53 = vld [vmem:[%s4969_s3 + $0x60] sm:$0xff]  }
  0x31   :  { %3609 = vmatprep.subr.bf16.mxu1 %v4000_v50 }
  0x33   :  { %3580 = vmatpush3.bf16.msra.mxu0 %v3844_v45 }
  0x34   :  { %3581 = vmatprep.subr.bf16.mxu0 %v3845_v46  ;;  %3610 = vmatpush3.bf16.msra.mxu1 %v3851_v16 }
  0x35   :  { %3611 = vmatprep.subr.bf16.mxu1 %v4000_v50 }
  0x37   :  { %3582 = vmatpush3.bf16.msra.mxu0 %v3845_v46 }
  0x38   :  { %3583 = vmatprep.subr.bf16.mxu0 %v3846_v47  ;;  %3612 = vmatpush3.bf16.msra.mxu1 %v3853_v22 }
  0x39   :  { %3613 = vmatprep.subr.bf16.mxu1 %v4000_v50 }
  0x3b   :  { %3584 = vmatpush3.bf16.msra.mxu0 %v3846_v47 }
  0x3c   :  { %3589 = vmatprep.subr.bf16.mxu0 %v4000_v50  ;;  %3614 = vmatpush3.bf16.msra.mxu1 %v3855_v29 }
  0x3d   :  { %3615 = vmatprep.subr.bf16.mxu1 %v4000_v50 }
  0x3e   :  { %3586 = vmatmul.mubr.msk.bf16.vlgmr.msra.gmra.mrb[8].mxu0 %vm114_vm0, %v472_v49 }
  0x3f   :  { %3590 = vmatpush3.bf16.msra.mxu0 %v3848_v52  ;;  %3601 = vmatprep.mubr.msk.bf16.mxu0 %vm4001_vm3, %v4000_v50 }
  0x40   :  { %3591 = vmatprep.subr.bf16.mxu0 %v4000_v50  ;;  %3616 = vmatpush3.bf16.msra.mxu1 %v3857_v34 }
  0x41   :  { %3621 = vmatprep.subr.bf16.mxu1 %v4000_v50 }
  0x43   :  { %3592 = vmatpush3.bf16.msra.mxu0 %v3850_v54 }
  0x44   :  { %3593 = vmatprep.subr.bf16.mxu0 %v4000_v50 }
  0x47   :  { %3594 = vmatpush3.bf16.msra.mxu0 %v3852_v17 }
  0x48   :  { %3595 = vmatprep.subr.bf16.mxu0 %v4000_v50 }
  0x4b   :  { %3596 = vmatpush3.bf16.msra.mxu0 %v3854_v25 }
  0x4c   :  { %3597 = vmatprep.subr.bf16.mxu0 %v4000_v50 }
  0x4f   :  { %3598 = vmatpush3.bf16.msra.mxu0 %v3856_v30 }
  0x50   :  { %3599 = vmatprep.subr.bf16.mxu0 %v4000_v50 }
  0x53   :  { %3600 = vmatpush3.bf16.msra.mxu0 %v3858_v37 }
  0x54   :  { %3669 = vmatprep.subr.bf16.mxu0 %v4000_v50 }
  0xe9   :  { %v3531_v55 = vpop.f32.mrb[0].mxu0  ;;  %v3545_v56 = vpop.f32.mrb[0].mxu1 }
  0xea   :  { %v155_v57 = vpop.f32.mrb[1].mxu0  ;;  %v248_v58 = vadd.f32 %v3545_v56, %v3531_v55  ;;  %v239_v59 = vpop.f32.mrb[1].mxu1  ;;  %v3860_v55 = vld [vmem:[%s4969_s3 + $0x68] sm:$0xff]   ;;  %v3861_v56 = vld [vmem:[%s4969_s3 + $0x70] sm:$0xff]  }
  0xeb   :  { %v3532_v60 = vpop.f32.mrb[2].mxu0  ;;  %v240_v61 = vadd.f32 %v239_v59, %v155_v57  ;;  %v3546_v62 = vpop.f32.mrb[2].mxu1  ;;  %v3862_v57 = vld [vmem:[%s4969_s3 + $0x78] sm:$0xff]   ;;  %v3864_v59 = vld [vmem:[%s4969_s3 + $0x88] sm:$0xff]  }
  0xec   :  { %v158_v63 = vpop.f32.mrb[3].mxu0  ;;  %v242_v0 = vpop.f32.mrb[3].mxu1  ;;  %v3865_v62 = vld [vmem:[%s4969_s3 + $0x90] sm:$0xff]  }
  0xed   :  { %v243_v1 = vadd.f32 %v242_v0, %v158_v63  ;;  %v3866_v0 = vld [vmem:[%s4969_s3 + $0x98] sm:$0xff]  }
  0xfd   :  { %v3559_v2 = vpop.f32.mrb[4].mxu0  ;;  %v3573_v5 = vpop.f32.mrb[4].mxu1 }
  0xfe   :  { %v358_v3 = vadd.f32 %v3559_v2, %v248_v58  ;;  %v342_v4 = vpop.f32.mrb[5].mxu0  ;;  %v448_v8 = vpop.f32.mrb[5].mxu1  ;;  %v3863_v58 = vld [vmem:[%s4969_s3 + $0x80] sm:$0xff]   ;;  %v3868_v2 = vld [vmem:[%s4969_s3 + $0xa8] sm:$0xff]  }
  0xff   :  { %v356_v6 = vadd.f32 %v342_v4, %v240_v61  ;;  %v3560_v7 = vpop.f32.mrb[6].mxu0  ;;  %v3574_v11 = vpop.f32.mrb[6].mxu1  ;;  %v3870_v4 = vld [vmem:[%s4969_s3 + $0xb8] sm:$0xff]  }
 0x100   :  { %v464_v9 = vadd.f32 %v3573_v5, %v358_v3  ;;  %v345_v10 = vpop.f32.mrb[7].mxu0  ;;  %v451_v14 = vpop.f32.mrb[7].mxu1  ;;  %v3869_v3 = vld [vmem:[%s4969_s3 + $0xb0] sm:$0xff]   ;;  %v3871_v7 = vld [vmem:[%s4969_s3 + $0xc0] sm:$0xff]   ;;  %v3874_v11 = vld [vmem:[%s4969_s3 + $0xd8] sm:$0xff]  }
 0x101   :  { %v357_v12 = vadd.f32 %v345_v10, %v243_v1  ;;  %v462_v13 = vadd.f32 %v448_v8, %v356_v6  ;;  %v3867_v1 = vld [vmem:[%s4969_s3 + $0xa0] sm:$0xff]   ;;  %v3873_v10 = vld [vmem:[%s4969_s3 + $0xd0] sm:$0xff]  }
 0x103   :  { %v463_v15 = vadd.f32 %v451_v14, %v357_v12  ;;  %v3875_v12 = vld [vmem:[%s4969_s3 + $0xe0] sm:$0xff]  }
 0x111   :  { %v3587_v18 = vpop.f32.mrb[8].mxu0 }
 0x112   :  { %v570_v19 = vadd.f32 %v3587_v18, %v464_v9  ;;  %v554_v20 = vpop.f32.mrb[9].mxu0  ;;  %v3872_v9 = vld [vmem:[%s4969_s3 + $0xc8] sm:$0xff]  }
 0x113   :  { %v568_v23 = vadd.f32 %v554_v20, %v462_v13  ;;  %v3588_v24 = vpop.f32.mrb[10].mxu0  ;;  %v3876_v13 = vld [vmem:[%s4969_s3 + $0xe8] sm:$0xff]   ;;  %s4003_s3 = smov 80  }
 0x114   :  { %v557_v26 = vpop.f32.mrb[11].mxu0  ;;  %v575_v31 = vrot.slane %v570_v19, 2 }
 0x115   :  { %v585_v27 = vadd.f32 %v3016_v21, %v568_v23  ;;  %v569_v28 = vadd.f32 %v557_v26, %v463_v15 }
 0x117   :  { %v574_v32 = vrot.slane %v569_v28, 2  ;;  %v587_v33 = vmul.f32 0.2, %v585_v27 }
 0x119   :  { %v576_v35 = vsel %vm573_vm2, %v574_v32, %v575_v31  ;;  %v589_v36 = vmax.f32 %v585_v27, %v587_v33 }
 0x11a   :  { %v586_v38 = vadd.f32 %v3016_v21, %v576_v35 }
 0x11b   :  { %596 = vrot.lane.b32.xlu0 %v589_v36, %s4002_s18 }
 0x11c   :  { %v588_v39 = vmul.f32 0.2, %v586_v38 }
 0x11e   :  { %v590_v40 = vmax.f32 %v586_v38, %v588_v39 }
 0x120   :  { %604 = vrot.lane.b32.xlu0 %v590_v40, %s4002_s18 }
 0x18d   :  { %v597_v41 = vpop.permute.xlu0 %596 }
 0x18e   :  { %v600_v42 = vsel %vm599_vm4, 0.0, %v597_v41 }
 0x18f   :  { %v601_v43 = vsel %vm114_vm0, %v600_v42, 0.0 }
 0x190   :  { %602 = vst.msk [vmem:[#allocation2 + $0x2] sm:$0xff] %vm591_vm1, %v601_v43 }
 0x192   :  { %v605_v44 = vpop.permute.xlu0 %604 }
 0x193   :  { %v607_v45 = vsel %vm599_vm4, 0.0, %v605_v44 }
 0x194   :  { %v608_v46 = vsel %vm114_vm0, %v607_v45, 0.0  ;;  %v1149_v45 = vlaneseq }
 0x195   :  { %609 = vst.msk [vmem:[#allocation2 + $0xe] sm:$0xff] %vm591_vm1, %v608_v46 }
 0x196   :  { %v1150_v46 = vshrl.u32 %v1149_v45, 7 }
 0x19c   :  { %v627_v47 = vld [vmem:[#allocation2 + $0x1] ss:$2 sm:$0xff]  ;;  %v629_v48 = vld [vmem:[#allocation2 + $0x11] ss:$2 sm:$0x3] }
 0x19d   :  { %v630_v49 = vpack.c.bf16 %v629_v48, %v627_v47  ;;  %v610_v51 = vld [vmem:[#allocation2] ss:$2 sm:$0xff]  ;;  %v612_v52 = vld [vmem:[#allocation2 + $0x10] ss:$2 sm:$0x3] }
 0x19e   :  { %v613_v54 = vpack.c.bf16 %v612_v52, %v610_v51  ;;  %v805_v60 = vld [vmem:[#allocation2 + $0x2] ss:$2 sm:$0xff]  ;;  %v807_v61 = vld [vmem:[#allocation2 + $0x12] ss:$2 sm:$0x3]  ;;  %v4387_v51 = vsub.s32 0, %v1150_v46 }
 0x19f   :  { %3602 = vmatmul.mubr.msk.bf16.vlgmr.msra.gmra.mrb[12].mxu0 %vm591_vm1, %v630_v49  ;;  %v808_v63 = vpack.c.bf16 %v807_v61, %v805_v60  ;;  %v905_v5 = vld [vmem:[#allocation2 + $0x3] ss:$2 sm:$0xff]  ;;  %v907_v6 = vld [vmem:[#allocation2 + $0x13] ss:$2 sm:$0x3] }
 0x1a0   :  { %3618 = vmatmul.mubr.msk.bf16.vlgmr.msra.gmra.mrb[8].mxu1 %vm591_vm1, %v613_v54  ;;  %3685 = vmatprep.mubr.msk.bf16.mxu0 %vm4001_vm3, %v4000_v50  ;;  %v908_v8 = vpack.c.bf16 %v907_v6, %v905_v5  ;;  %v1005_v14 = vld [vmem:[#allocation2 + $0x4] ss:$2 sm:$0xff]  ;;  %v1007_v15 = vld [vmem:[#allocation2 + $0x14] ss:$2 sm:$0x3] }
 0x1a1   :  { %3622 = vmatpush3.bf16.msra.mxu1 %v3859_v53  ;;  %3633 = vmatprep.mubr.msk.bf16.mxu1 %vm4001_vm3, %v4000_v50  ;;  %v1008_v16 = vpack.c.bf16 %v1007_v15, %v1005_v14  ;;  %v3877_v15 = vld [vmem:[%s4973_s6 + $0x40] sm:$0xff]  }
 0x1a2   :  { %3623 = vmatprep.subr.bf16.mxu1 %v4000_v50  ;;  %3670 = vmatpush3.bf16.msra.mxu0 %v3877_v15  ;;  %v3908_v15 = vld [vmem:[%s4973_s6 + $0xf8] sm:$0xff]  }
 0x1a3   :  { %3671 = vmatprep.subr.bf16.mxu0 %v4000_v50 }
 0x1a5   :  { %3624 = vmatpush3.bf16.msra.mxu1 %v3860_v55 }
 0x1a6   :  { %3625 = vmatprep.subr.bf16.mxu1 %v4000_v50 }
 0x1a9   :  { %3626 = vmatpush3.bf16.msra.mxu1 %v3861_v56 }
 0x1aa   :  { %3627 = vmatprep.subr.bf16.mxu1 %v4000_v50 }
 0x1ad   :  { %3628 = vmatpush3.bf16.msra.mxu1 %v3862_v57 }
 0x1ae   :  { %3629 = vmatprep.subr.bf16.mxu1 %v4000_v50 }
 0x1b1   :  { %3630 = vmatpush3.bf16.msra.mxu1 %v3863_v58 }
 0x1b2   :  { %3631 = vmatprep.subr.bf16.mxu1 %v4000_v50 }
 0x1b5   :  { %3632 = vmatpush3.bf16.msra.mxu1 %v3864_v59 }
 0x1b6   :  { %3637 = vmatprep.subr.bf16.mxu1 %v4000_v50 }
 0x1b8   :  { %3634 = vmatmul.mubr.msk.bf16.vlgmr.msra.gmra.mrb[8].mxu1 %vm591_vm1, %v808_v63 }
 0x1b9   :  { %3638 = vmatpush3.bf16.msra.mxu1 %v3865_v62  ;;  %3649 = vmatprep.mubr.msk.bf16.mxu1 %vm4001_vm3, %v4000_v50 }
 0x1ba   :  { %3639 = vmatprep.subr.bf16.mxu1 %v4000_v50 }
 0x1bd   :  { %3640 = vmatpush3.bf16.msra.mxu1 %v3866_v0 }
 0x1be   :  { %3641 = vmatprep.subr.bf16.mxu1 %v4000_v50 }
 0x1c1   :  { %3642 = vmatpush3.bf16.msra.mxu1 %v3867_v1  ;;  %v1180_v1 = vld [vmem:[%s4971_s5] sm:$0x1] }
 0x1c2   :  { %3643 = vmatprep.subr.bf16.mxu1 %v4000_v50 }
 0x1c5   :  { %3644 = vmatpush3.bf16.msra.mxu1 %v3868_v2  ;;  %v1207_v2 = vrot.slane %v1180_v1, %v4387_v51 }
 0x1c6   :  { %3645 = vmatprep.subr.bf16.mxu1 %v4000_v50 }
 0x1c9   :  { %3646 = vmatpush3.bf16.msra.mxu1 %v3869_v3 }
 0x1ca   :  { %3647 = vmatprep.subr.bf16.mxu1 %v4000_v50 }
 0x1cd   :  { %3648 = vmatpush3.bf16.msra.mxu1 %v3870_v4 }
 0x1ce   :  { %3653 = vmatprep.subr.bf16.mxu1 %v4000_v50 }
 0x1d0   :  { %3650 = vmatmul.mubr.msk.bf16.vlgmr.msra.gmra.mrb[8].mxu1 %vm591_vm1, %v908_v8 }
 0x1d1   :  { %3654 = vmatpush3.bf16.msra.mxu1 %v3871_v7  ;;  %3665 = vmatprep.mubr.msk.bf16.mxu1 %vm4001_vm3, %v4000_v50 }
 0x1d2   :  { %3655 = vmatprep.subr.bf16.mxu1 %v4000_v50 }
 0x1d5   :  { %3656 = vmatpush3.bf16.msra.mxu1 %v3872_v9 }
 0x1d6   :  { %3657 = vmatprep.subr.bf16.mxu1 %v4000_v50 }
 0x1d9   :  { %3658 = vmatpush3.bf16.msra.mxu1 %v3873_v10 }
 0x1da   :  { %3659 = vmatprep.subr.bf16.mxu1 %v4000_v50 }
 0x1dd   :  { %3660 = vmatpush3.bf16.msra.mxu1 %v3874_v11  ;;  %v1176_v11 = vld [vmem:[%s4972_s4] sm:$0x1] }
 0x1de   :  { %3661 = vmatprep.subr.bf16.mxu1 %v4000_v50 }
 0x1e1   :  { %3662 = vmatpush3.bf16.msra.mxu1 %v3875_v12 }
 0x1e2   :  { %3663 = vmatprep.subr.bf16.mxu1 %v4000_v50 }
 0x1e5   :  { %3664 = vmatpush3.bf16.msra.mxu1 %v3876_v13 }
 0x1e8   :  { %3666 = vmatmul.mubr.msk.bf16.vlgmr.msra.gmra.mrb[8].mxu1 %vm591_vm1, %v1008_v16  ;;  %v3878_v16 = vld [vmem:[%s4973_s6 + $0x48] sm:$0xff]  }
 0x1e9   :  { %3672 = vmatpush3.bf16.msra.mxu0 %v3878_v16 }
 0x1ea   :  { %3673 = vmatprep.subr.bf16.mxu0 %v4000_v50 }
 0x272   :  { %v717_v17 = vpop.f32.mrb[12].mxu0 }
 0x273   :  { %v3603_v18 = vpop.f32.mrb[13].mxu0 }
 0x274   :  { %v720_v19 = vpop.f32.mrb[14].mxu0  ;;  %v3880_v18 = vld [vmem:[%s4973_s6 + $0x58] sm:$0xff]  }
 0x275   :  { %v3604_v20 = vpop.f32.mrb[15].mxu0 }
 0x2bb   :  { %v1095_v21 = vpop.f32.mrb[8].mxu1 }
 0x2bc   :  { %v3769_v22 = vadd.f32 %v1095_v21, %v717_v17  ;;  %v3667_v23 = vpop.f32.mrb[9].mxu1  ;;  %v3879_v17 = vld [vmem:[%s4973_s6 + $0x50] sm:$0xff]  }
 0x2bd   :  { %v1098_v24 = vpop.f32.mrb[10].mxu1  ;;  %3674 = vmatpush3.bf16.msra.mxu0 %v3879_v17  ;;  %v3909_v17 = vld [vmem:[%s4973_s6 + $0x100] sm:$0xff]  }
 0x2be   :  { %v3770_v25 = vadd.f32 %v1098_v24, %v720_v19  ;;  %v3668_v26 = vpop.f32.mrb[11].mxu1  ;;  %v1106_v27 = vrot.slane %v3769_v22, 2  ;;  %3675 = vmatprep.subr.bf16.mxu0 %v4000_v50  ;;  %v3881_v19 = vld [vmem:[%s4973_s6 + $0x60] sm:$0xff]  }
 0x2c0   :  { %v1107_v28 = vrot.slane %v3770_v25, 2 }
 0x2c1   :  { %3676 = vmatpush3.bf16.msra.mxu0 %v3880_v18 }
 0x2c2   :  { %v1108_v29 = vsel %vm573_vm2, %v1106_v27, %v1107_v28  ;;  %3677 = vmatprep.subr.bf16.mxu0 %v4000_v50 }
 0x2c3   :  { %v1111_v30 = vsel %vm1110_vm6, %v3769_v22, %v1108_v29 }
 0x2c4   :  { %v1113_v31 = vsel %vm1112_vm5, %v1111_v30, 0.0 }
 0x2c5   :  { %v1114_v32 = vrot.slane %v1113_v31, 4  ;;  %3678 = vmatpush3.bf16.msra.mxu0 %v3881_v19  ;;  %v3910_v19 = vld [vmem:[%s4973_s6 + $0x108] sm:$0xff]  }
 0x2c6   :  { %3679 = vmatprep.subr.bf16.mxu0 %v4000_v50 }
 0x2c7   :  { %v1115_v33 = vadd.f32 %v1114_v32, %v1113_v31  ;;  %v3882_v31 = vld [vmem:[%s4973_s6 + $0x68] sm:$0xff]  }
 0x2c9   :  { %v1116_v34 = vrot.slane %v1115_v33, 2  ;;  %3680 = vmatpush3.bf16.msra.mxu0 %v3882_v31 }
 0x2ca   :  { %3681 = vmatprep.subr.bf16.mxu0 %v4000_v50 }
 0x2cb   :  { %v1117_v35 = vadd.f32 %v1116_v34, %v1115_v33  ;;  %v3883_v34 = vld [vmem:[%s4973_s6 + $0x70] sm:$0xff]  }
 0x2cd   :  { %v1118_v36 = vrot.slane %v1117_v35, 1  ;;  %3682 = vmatpush3.bf16.msra.mxu0 %v3883_v34 }
 0x2ce   :  { %3683 = vmatprep.subr.bf16.mxu0 %v4000_v50 }
 0x2cf   :  { %v1119_v37 = vadd.f32 %v1118_v36, %v1117_v35 }
 0x2d1   :  { %1129 = vrot.lane.b32.xlu0 %v1119_v37, %s4003_s3  ;;  %1121 = vrot.lane.b32.xlu1 %v1119_v37, %s4004_s19 }
 0x2d5   :  { %1125 = vrot.lane.b32.xlu1 %v1119_v37, %s4005_s20 }
 0x343   :  { %v1122_v38 = vpop.permute.xlu1 %1121  ;;  %v1130_v42 = vpop.permute.xlu0 %1129 }
 0x344   :  { %v1124_v39 = vadd.f32 %v1122_v38, %v1119_v37  ;;  %v3884_v38 = vld [vmem:[%s4973_s6 + $0x78] sm:$0xff]  }
 0x345   :  { %3684 = vmatpush3.bf16.msra.mxu0 %v3884_v38 }
 0x346   :  { %3689 = vmatprep.subr.bf16.mxu0 %v4000_v50 }
 0x347   :  { %v1126_v40 = vpop.permute.xlu1 %1125 }
 0x348   :  { %v1128_v41 = vadd.f32 %v1126_v40, %v1124_v39 }
 0x34a   :  { %v1132_v43 = vadd.f32 %v1130_v42, %v1128_v41 }
 0x34c   :  { %v1133_v44 = vmul.f32 0.03125, %v1132_v43 }
 0x34e   :  { %1138 = vrot.lane.b32.xlu0 %v1133_v44, %s4006_s21  ;;  %1135 = vrot.lane.b32.xlu1 %v1133_v44, %s4002_s18 }
 0x352   :  { %1141 = vrot.lane.b32.xlu1 %v1133_v44, %s4007_s22 }
 0x3c0   :  { %v1136_v47 = vpop.permute.xlu1 %1135  ;;  %v1139_v48 = vpop.permute.xlu0 %1138 }
 0x3c1   :  { %v1144_v49 = vsel %vm599_vm4, %v1133_v44, %v1136_v47 }
 0x3c2   :  { %v1146_v52 = vsel %vm1145_vm7, %v1144_v49, %v1139_v48  ;;  %v3885_v49 = vld [vmem:[%s4973_s6] sm:$0xff]  }
 0x3c4   :  { %v1142_v53 = vpop.permute.xlu1 %1141 }
 0x3c5   :  { %v1148_v54 = vsel %vm1147_vm8, %v1146_v52, %v1142_v53  ;;  %v3886_v53 = vld [vmem:[%s4973_s6 + $0x8] sm:$0xff]  }
 0x3c6   :  { %v1152_v55 = vrot.slane %v1148_v54, %v4387_v51  ;;  %v3887_v54 = vld [vmem:[%s4973_s6 + $0x10] sm:$0xff]  }
 0x3c8   :  { %v4392_v56 = vsub.f32 %v1111_v30, %v1152_v55  ;;  %v3888_v55 = vld [vmem:[%s4973_s6 + $0x18] sm:$0xff]  }
 0x3ca   :  { %v1154_v57 = vmul.f32 %v4392_v56, %v4392_v56 }
 0x3cc   :  { %v1155_v58 = vsel %vm1112_vm5, %v1154_v57, 0.0  ;;  %v3890_v57 = vld [vmem:[%s4973_s6 + $0x28] sm:$0xff]  }
 0x3cd   :  { %v1156_v59 = vrot.slane %v1155_v58, 4 }
 0x3cf   :  { %v1157_v60 = vadd.f32 %v1156_v59, %v1155_v58  ;;  %v3891_v58 = vld [vmem:[%s4973_s6 + $0x30] sm:$0xff]   ;;  %v3892_v59 = vld [vmem:[%s4973_s6 + $0x38] sm:$0xff]  }
 0x3d1   :  { %v1158_v61 = vrot.slane %v1157_v60, 2 }
 0x3d3   :  { %v1159_v62 = vadd.f32 %v1158_v61, %v1157_v60  ;;  %v3893_v61 = vld [vmem:[%s4973_s6 + $0x80] sm:$0xff]  }
 0x3d5   :  { %v1160_v63 = vrot.slane %v1159_v62, 1 }
 0x3d7   :  { %v1161_v0 = vadd.f32 %v1160_v63, %v1159_v62  ;;  %v3894_v63 = vld [vmem:[%s4973_s6 + $0x88] sm:$0xff]  }
 0x3d9   :  { %1167 = vrot.lane.b32.xlu1 %v1161_v0, %s4005_s20  ;;  %1163 = vrot.lane.b32.xlu0 %v1161_v0, %s4004_s19 }
 0x3dd   :  { %1171 = vrot.lane.b32.xlu0 %v1161_v0, %s4003_s3 }
 0x3e1   :  { %1208 = vrot.lane.b32.xlu0 %v1207_v2, %s4002_s18 }
 0x44b   :  { %v1164_v3 = vpop.permute.xlu0 %1163  ;;  %v1168_v5 = vpop.permute.xlu1 %1167 }
 0x44c   :  { %v1166_v4 = vadd.f32 %v1164_v3, %v1161_v0  ;;  %v3895_v0 = vld [vmem:[%s4973_s6 + $0x90] sm:$0xff]   ;;  %v3898_v3 = vld [vmem:[%s4973_s6 + $0xa8] sm:$0xff]  }
 0x44e   :  { %v1170_v6 = vadd.f32 %v1168_v5, %v1166_v4  ;;  %v3899_v4 = vld [vmem:[%s4973_s6 + $0xb0] sm:$0xff]   ;;  %v3900_v5 = vld [vmem:[%s4973_s6 + $0xb8] sm:$0xff]  }
 0x44f   :  { %v1172_v7 = vpop.permute.xlu0 %1171 }
 0x450   :  { %v1174_v8 = vadd.f32 %v1172_v7, %v1170_v6  ;;  %v4527_v6 = vld [vmem:[#allocation4] sm:$0xff] }
 0x451   :  { %1865 = vst.msk [vmem:[#allocation4 + $0x18] sm:$0xf] %vm1789_vm9, %v4527_v6 }
 0x452   :  { %v1175_v9 = vmul.f32 0.03125, %v1174_v8  ;;  %v3901_v8 = vld [vmem:[%s4973_s6 + $0xc0] sm:$0xff]   ;;  %1887 = vst.msk [vmem:[#allocation4 + $0x18] sm:$0x3] %vm1886_vm10, %v4527_v6 }
 0x453   :  { %v1209_v20 = vpop.permute.xlu0 %1208 }
 0x454   :  { %v1177_v10 = vadd.f32 1e-05, %v1175_v9  ;;  %v1217_v29 = vsel %vm599_vm4, %v1180_v1, %v1209_v20  ;;  %v3896_v1 = vld [vmem:[%s4973_s6 + $0x98] sm:$0xff]   ;;  %v3911_v20 = vld [vmem:[%s4973_s6 + $0x110] sm:$0xff]  }
 0x456   :  { %3993 = vrsqrt.f32 %v1177_v10  ;;  %v3903_v10 = vld [vmem:[%s4973_s6 + $0xd0] sm:$0xff]  }
 0x460   :  { %v3994_v12 = vpop.eup %3993 }
 0x461   :  { %v1179_v13 = vmul.f32 %v3994_v12, %v1176_v11  ;;  %v3904_v11 = vld [vmem:[%s4973_s6 + $0xd8] sm:$0xff]   ;;  %v3905_v12 = vld [vmem:[%s4973_s6 + $0xe0] sm:$0xff]  }
 0x463   :  { %v1185_v14 = vrot.slane %v1179_v13, %v4387_v51 }
 0x465   :  { %1189 = vrot.lane.b32.xlu0 %v1185_v14, %s4006_s21  ;;  %1186 = vrot.lane.b32.xlu1 %v1185_v14, %s4002_s18 }
 0x469   :  { %1192 = vrot.lane.b32.xlu1 %v1185_v14, %s4007_s22  ;;  %1214 = vrot.lane.b32.xlu0 %v1207_v2, %s4007_s22  ;;  %v3907_v14 = vld [vmem:[%s4973_s6 + $0xf0] sm:$0xff]  }
 0x46d   :  { %1211 = vrot.lane.b32.xlu1 %v1207_v2, %s4006_s21  ;;  %v3897_v2 = vld [vmem:[%s4973_s6 + $0xa0] sm:$0xff]  }
 0x4d7   :  { %v1187_v21 = vpop.permute.xlu1 %1186  ;;  %v1190_v23 = vpop.permute.xlu0 %1189 }
 0x4d8   :  { %v1195_v22 = vsel %vm599_vm4, %v1179_v13, %v1187_v21  ;;  %v3906_v13 = vld [vmem:[%s4973_s6 + $0xe8] sm:$0xff]   ;;  %v3912_v21 = vld [vmem:[%s4973_s6 + $0x118] sm:$0xff]  }
 0x4d9   :  { %v1196_v24 = vsel %vm1145_vm7, %v1195_v22, %v1190_v23  ;;  %v3913_v22 = vld [vmem:[%s4973_s6 + $0x120] sm:$0xff]   ;;  %v3914_v23 = vld [vmem:[%s4973_s6 + $0x128] sm:$0xff]  }
 0x4db   :  { %v1193_v25 = vpop.permute.xlu1 %1192  ;;  %v1215_v28 = vpop.permute.xlu0 %1214 }
 0x4dc   :  { %v1197_v26 = vsel %vm1147_vm8, %v1196_v24, %v1193_v25  ;;  %v3915_v24 = vld [vmem:[%s4973_s6 + $0x130] sm:$0xff]   ;;  %v3916_v25 = vld [vmem:[%s4973_s6 + $0x138] sm:$0xff]  }
 0x4dd   :  { %v1201_v27 = vrot.slane %v1197_v26, %v4387_v51 }
 0x4df   :  { %v1212_v30 = vpop.permute.xlu1 %1211  ;;  %v1202_v35 = vmul.f32 %v1201_v27, %v4392_v56  ;;  %v3889_v56 = vld [vmem:[%s4973_s6 + $0x20] sm:$0xff]  }
 0x4e0   :  { %v1218_v32 = vsel %vm1145_vm7, %v1217_v29, %v1212_v30 }
 0x4e1   :  { %v1219_v33 = vsel %vm1147_vm8, %v1218_v32, %v1215_v28 }
 0x4e2   :  { %v1223_v36 = vrot.slane %v1219_v33, %v4387_v51 }
 0x4e4   :  { %v1224_v37 = vadd.f32 %v1223_v36, %v1202_v35 }
 0x4e6   :  { %v1225_v39 = vmul.f32 0.2, %v1224_v37 }
 0x4e8   :  { %v1226_v40 = vmax.f32 %v1224_v37, %v1225_v39 }
 0x4ea   :  { %1230 = vrot.lane.b32.xlu1 %v1226_v40, %s4006_s21  ;;  %v1236_v41 = vrot.slane %v1226_v40, 4 }
 0x4ec   :  { %1237 = vrot.lane.b32.xlu0 %v1236_v41, %s4006_s21 }
 0x55c   :  { %v1231_v42 = vpop.permute.xlu1 %1230 }
 0x55d   :  { %v1233_v43 = vsel %vm1145_vm7, 0.0, %v1231_v42 }
 0x55e   :  { %v1234_v44 = vsel %vm591_vm1, %v1233_v43, 0.0  ;;  %v1238_v45 = vpop.permute.xlu0 %1237 }
 0x55f   :  { %1235 = vst [vmem:[#allocation3 + $0x2] sm:$0xf] %v1234_v44  ;;  %v1240_v46 = vsel %vm1145_vm7, 0.0, %v1238_v45 }
 0x560   :  { %v1241_v47 = vsel %vm591_vm1, %v1240_v46, 0.0 }
 0x561   :  { %1242 = vst [vmem:[#allocation3 + $0xa] sm:$0xf] %v1241_v47 }
 0x568   :  { %v1262_v48 = vld [vmem:[#allocation3 + $0x1] ss:$2 sm:$0x3f]  ;;  %v1243_v60 = vld [vmem:[#allocation3] ss:$2 sm:$0x3f] }
 0x569   :  { %v1263_v52 = vpack.c.bf16 %v1262_v48, %v1262_v48  ;;  %v1244_v62 = vpack.c.bf16 %v1243_v60, %v1243_v60  ;;  %v1458_v7 = vld [vmem:[#allocation3 + $0x2] ss:$2 sm:$0x3f]  ;;  %v1567_v16 = vld [vmem:[#allocation3 + $0x3] ss:$2 sm:$0x3f] }
 0x56a   :  { %v1459_v9 = vpack.c.bf16 %v1458_v7, %v1458_v7  ;;  %v1568_v18 = vpack.c.bf16 %v1567_v16, %v1567_v16  ;;  %v1676_v26 = vld [vmem:[#allocation3 + $0x4] ss:$2 sm:$0x3f]  ;;  %v3918_v7 = vld [vmem:[%s4976_s9 + $0x8] sm:$0xff]  }
 0x56b   :  { %3686 = vmatmul.mubr.bf16.vlgmr.msra.gmra.mrb[16].mxu0 %v1263_v52  ;;  %v1677_v27 = vpack.c.bf16 %v1676_v26, %v1676_v26  ;;  %v3929_v16 = vld [vmem:[%s4976_s9 + $0x88] sm:$0xff]   ;;  %v1874_v26 = vrot.slane %v4527_v6, 6 }
 0x56c   :  { %3690 = vmatpush3.bf16.msra.mxu0 %v3885_v49  ;;  %3705 = vmatprep.mubr.msk.bf16.mxu0 %vm4001_vm3, %v4000_v50 }
 0x56d   :  { %3691 = vmatprep.subr.bf16.mxu0 %v4000_v50  ;;  %1879 = vst.msk [vmem:[#allocation4 + $0x8] sm:$0xc] %vm1878_vm12, %v1874_v26 }
 0x570   :  { %3692 = vmatpush3.bf16.msra.mxu0 %v3886_v53 }
 0x571   :  { %3693 = vmatprep.subr.bf16.mxu0 %v4000_v50 }
 0x574   :  { %3694 = vmatpush3.bf16.msra.mxu0 %v3887_v54 }
 0x575   :  { %3695 = vmatprep.subr.bf16.mxu0 %v4000_v50 }
 0x578   :  { %3696 = vmatpush3.bf16.msra.mxu0 %v3888_v55 }
 0x579   :  { %3697 = vmatprep.subr.bf16.mxu0 %v4000_v50 }
 0x57c   :  { %3698 = vmatpush3.bf16.msra.mxu0 %v3889_v56 }
 0x57d   :  { %3699 = vmatprep.subr.bf16.mxu0 %v4000_v50 }
 0x580   :  { %3700 = vmatpush3.bf16.msra.mxu0 %v3890_v57 }
 0x581   :  { %3701 = vmatprep.subr.bf16.mxu0 %v4000_v50 }
 0x584   :  { %3702 = vmatpush3.bf16.msra.mxu0 %v3891_v58  ;;  %v4616_v58 = vld [vmem:[%s4974_s8] sm:$0x1] }
 0x585   :  { %3703 = vmatprep.subr.bf16.mxu0 %v4000_v50 }
 0x588   :  { %3704 = vmatpush3.bf16.msra.mxu0 %v3892_v59  ;;  %v1850_v59 = vrot.slane %v4616_v58, %v4387_v51 }
 0x589   :  { %3709 = vmatprep.subr.bf16.mxu0 %v4000_v50 }
 0x58b   :  { %3706 = vmatmul.mubr.bf16.vlgmr.msra.gmra.mrb[16].mxu0 %v1244_v62 }
 0x58c   :  { %3710 = vmatpush3.bf16.msra.mxu0 %v3893_v61  ;;  %3725 = vmatprep.mubr.msk.bf16.mxu0 %vm4001_vm3, %v4000_v50 }
 0x58d   :  { %3711 = vmatprep.subr.bf16.mxu0 %v4000_v50 }
 0x590   :  { %3712 = vmatpush3.bf16.msra.mxu0 %v3894_v63 }
 0x591   :  { %3713 = vmatprep.subr.bf16.mxu0 %v4000_v50 }
 0x594   :  { %3714 = vmatpush3.bf16.msra.mxu0 %v3895_v0  ;;  %v1827_v0 = vld [vmem:[%s4975_s7] sm:$0x1] }
 0x595   :  { %3715 = vmatprep.subr.bf16.mxu0 %v4000_v50 }
 0x598   :  { %3716 = vmatpush3.bf16.msra.mxu0 %v3896_v1 }
 0x599   :  { %3717 = vmatprep.subr.bf16.mxu0 %v4000_v50 }
 0x59c   :  { %3718 = vmatpush3.bf16.msra.mxu0 %v3897_v2 }
 0x59d   :  { %3719 = vmatprep.subr.bf16.mxu0 %v4000_v50 }
 0x5a0   :  { %3720 = vmatpush3.bf16.msra.mxu0 %v3898_v3 }
 0x5a1   :  { %3721 = vmatprep.subr.bf16.mxu0 %v4000_v50  ;;  %v3902_v50 = vld [vmem:[%s4973_s6 + $0xc8] sm:$0xff]   ;;  %s4009_s6 = smov 64  }
 0x5a4   :  { %3722 = vmatpush3.bf16.msra.mxu0 %v3899_v4  ;;  %v4008_v4 = vmov 0  }
 0x5a5   :  { %3723 = vmatprep.subr.bf16.mxu0 %v4527_v6  ;;  %2152 = vmatprep.subr.bf16.mxu1 %v4008_v4 }
 0x5a8   :  { %3724 = vmatpush3.bf16.msra.mxu0 %v3900_v5  ;;  %v3917_v5 = vld [vmem:[%s4976_s9] sm:$0xff]  }
 0x5a9   :  { %3729 = vmatprep.subr.bf16.mxu0 %v4527_v6  ;;  %2153 = vmatpush1.bf16.msra.mxu1 %v3917_v5 }
 0x5aa   :  { %2154 = vmatprep.subr.bf16.mxu1 %v4008_v4 }
 0x5ab   :  { %3726 = vmatmul.mubr.bf16.vlgmr.msra.gmra.mrb[16].mxu0 %v1459_v9  ;;  %v3921_v9 = vld [vmem:[%s4976_s9 + $0x68] sm:$0xff]  }
 0x5ac   :  { %3730 = vmatpush3.bf16.msra.mxu0 %v3901_v8  ;;  %3745 = vmatprep.mubr.msk.bf16.mxu0 %vm4001_vm3, %v4527_v6  ;;  %v3919_v8 = vld [vmem:[%s4976_s9 + $0x60] sm:$0xff]  }
 0x5ad   :  { %3731 = vmatprep.subr.bf16.mxu0 %v4527_v6  ;;  %2155 = vmatpush1.bf16.msra.mxu1 %v3918_v7 }
 0x5ae   :  { %2156 = vmatprep.subr.bf16.mxu1 %v4008_v4 }
 0x5b0   :  { %3732 = vmatpush3.bf16.msra.mxu0 %v3902_v50  ;;  %v3920_v50 = vld [vmem:[%s4976_s9 + $0x10] sm:$0xff]  }
 0x5b1   :  { %3733 = vmatprep.subr.bf16.mxu0 %v4527_v6  ;;  %2157 = vmatpush1.bf16.msra.mxu1 %v3920_v50  ;;  %v3944_v50 = vld [vmem:[%s4976_s9 + $0xd8] sm:$0xff]  }
 0x5b2   :  { %2158 = vmatprep.subr.bf16.mxu1 %v4008_v4 }
 0x5b4   :  { %3734 = vmatpush3.bf16.msra.mxu0 %v3903_v10  ;;  %v3923_v10 = vld [vmem:[%s4976_s9 + $0x70] sm:$0xff]  }
 0x5b5   :  { %3735 = vmatprep.subr.bf16.mxu0 %v4527_v6 }
 0x5b8   :  { %3736 = vmatpush3.bf16.msra.mxu0 %v3904_v11  ;;  %v3922_v11 = vld [vmem:[%s4976_s9 + $0x18] sm:$0xff]  }
 0x5b9   :  { %3737 = vmatprep.subr.bf16.mxu0 %v4527_v6  ;;  %2159 = vmatpush1.bf16.msra.mxu1 %v3922_v11  ;;  %v3946_v11 = vld [vmem:[%s4976_s9 + $0xe8] sm:$0xff]  }
 0x5ba   :  { %2160 = vmatprep.subr.bf16.mxu1 %v4008_v4 }
 0x5bc   :  { %3738 = vmatpush3.bf16.msra.mxu0 %v3905_v12  ;;  %v3925_v12 = vld [vmem:[%s4976_s9 + $0x78] sm:$0xff]  }
 0x5bd   :  { %3739 = vmatprep.subr.bf16.mxu0 %v4527_v6 }
 0x5c0   :  { %3740 = vmatpush3.bf16.msra.mxu0 %v3906_v13  ;;  %v3924_v13 = vld [vmem:[%s4976_s9 + $0x20] sm:$0xff]  }
 0x5c1   :  { %3741 = vmatprep.subr.bf16.mxu0 %v4527_v6  ;;  %2161 = vmatpush1.bf16.msra.mxu1 %v3924_v13  ;;  %v3948_v13 = vld [vmem:[%s4976_s9 + $0xf8] sm:$0xff]  }
 0x5c2   :  { %2162 = vmatprep.subr.bf16.mxu1 %v4008_v4 }
 0x5c4   :  { %3742 = vmatpush3.bf16.msra.mxu0 %v3907_v14  ;;  %v3927_v14 = vld [vmem:[%s4976_s9 + $0x80] sm:$0xff]  }
 0x5c5   :  { %3743 = vmatprep.subr.bf16.mxu0 %v4527_v6 }
 0x5c8   :  { %3744 = vmatpush3.bf16.msra.mxu0 %v3908_v15  ;;  %v3926_v15 = vld [vmem:[%s4976_s9 + $0x28] sm:$0xff]  }
 0x5c9   :  { %3749 = vmatprep.subr.bf16.mxu0 %v4527_v6  ;;  %2163 = vmatpush1.bf16.msra.mxu1 %v3926_v15  ;;  %v2345_v15 = vld [vmem:[#allocation4 + $0x8] sm:$0xf8] }
 0x5ca   :  { %2164 = vmatprep.subr.bf16.mxu1 %v4008_v4 }
 0x5cb   :  { %3746 = vmatmul.mubr.bf16.vlgmr.msra.gmra.mrb[16].mxu0 %v1568_v18  ;;  %v3931_v18 = vld [vmem:[%s4976_s9 + $0x90] sm:$0xff]  }
 0x5cc   :  { %3750 = vmatpush3.bf16.msra.mxu0 %v3909_v17  ;;  %3765 = vmatprep.mubr.msk.bf16.mxu0 %vm4001_vm3, %v4527_v6  ;;  %v3928_v17 = vld [vmem:[%s4976_s9 + $0x30] sm:$0xff]  }
 0x5cd   :  { %3751 = vmatprep.subr.bf16.mxu0 %v4527_v6  ;;  %2165 = vmatpush1.bf16.msra.mxu1 %v3928_v17  ;;  %v3950_v17 = vld [vmem:[%s4976_s9 + $0x108] sm:$0xff]  }
 0x5ce   :  { %2166 = vmatprep.subr.bf16.mxu1 %v4008_v4 }
 0x5d0   :  { %3752 = vmatpush3.bf16.msra.mxu0 %v3910_v19  ;;  %v3930_v19 = vld [vmem:[%s4976_s9 + $0x38] sm:$0xff]  }
 0x5d1   :  { %3753 = vmatprep.subr.bf16.mxu0 %v4527_v6  ;;  %2167 = vmatpush1.bf16.msra.mxu1 %v3930_v19  ;;  %v3951_v19 = vld [vmem:[%s4976_s9 + $0x110] sm:$0xff]  }
 0x5d2   :  { %2168 = vmatprep.subr.bf16.mxu1 %v4008_v4 }
 0x5d4   :  { %3754 = vmatpush3.bf16.msra.mxu0 %v3911_v20  ;;  %v3932_v20 = vld [vmem:[%s4976_s9 + $0x40] sm:$0xff]  }
 0x5d5   :  { %3755 = vmatprep.subr.bf16.mxu0 %v4527_v6  ;;  %2169 = vmatpush1.bf16.msra.mxu1 %v3932_v20 }
 0x5d6   :  { %2170 = vmatprep.subr.bf16.mxu1 %v4008_v4 }
 0x5d8   :  { %3756 = vmatpush3.bf16.msra.mxu0 %v3912_v21 }
 0x5d9   :  { %3757 = vmatprep.subr.bf16.mxu0 %v4527_v6 }
 0x5dc   :  { %3758 = vmatpush3.bf16.msra.mxu0 %v3913_v22  ;;  %v3933_v22 = vld [vmem:[%s4976_s9 + $0x98] sm:$0xff]  }
 0x5dd   :  { %3759 = vmatprep.subr.bf16.mxu0 %v4527_v6 }
 0x5e0   :  { %3760 = vmatpush3.bf16.msra.mxu0 %v3914_v23 }
 0x5e1   :  { %3761 = vmatprep.subr.bf16.mxu0 %v4527_v6 }
 0x5e4   :  { %3762 = vmatpush3.bf16.msra.mxu0 %v3915_v24  ;;  %v3934_v24 = vld [vmem:[%s4976_s9 + $0x48] sm:$0xff]  }
 0x5e5   :  { %3763 = vmatprep.subr.bf16.mxu0 %v4527_v6  ;;  %2171 = vmatpush1.bf16.msra.mxu1 %v3934_v24  ;;  %v3936_v6 = vld [vmem:[%s4976_s9 + $0x50] sm:$0xff]   ;;  %v3952_v24 = vld [vmem:[%s4976_s9 + $0x118] sm:$0xff]  }
 0x5e6   :  { %2172 = vmatprep.subr.bf16.mxu1 %v4008_v4 }
 0x5e8   :  { %3764 = vmatpush3.bf16.msra.mxu0 %v3916_v25 }
 0x5e9   :  { %2037 = vmatprep.subr.bf16.mxu0 %v4008_v4  ;;  %2173 = vmatpush1.bf16.msra.mxu1 %v3936_v6  ;;  %v3954_v6 = vld [vmem:[%s4976_s9 + $0x128] sm:$0xff]  }
 0x5ea   :  { %2174 = vmatprep.subr.bf16.mxu1 %v4008_v4 }
 0x5eb   :  { %3766 = vmatmul.mubr.bf16.vlgmr.msra.gmra.mrb[16].mxu0 %v1677_v27 }
 0x5ec   :  { %2038 = vmatpush1.bf16.msra.mxu0 %v3919_v8 }
 0x5ed   :  { %2039 = vmatprep.subr.bf16.mxu0 %v4008_v4 }
 0x5f0   :  { %2040 = vmatpush1.bf16.msra.mxu0 %v3921_v9  ;;  %v3943_v9 = vld [vmem:[%s4976_s9 + $0xd0] sm:$0xff]  }
 0x5f1   :  { %2041 = vmatprep.subr.bf16.mxu0 %v4008_v4 }
 0x5f4   :  { %2042 = vmatpush1.bf16.msra.mxu0 %v3923_v10  ;;  %v3945_v10 = vld [vmem:[%s4976_s9 + $0xe0] sm:$0xff]  }
 0x5f5   :  { %2043 = vmatprep.subr.bf16.mxu0 %v4008_v4 }
 0x5f8   :  { %2044 = vmatpush1.bf16.msra.mxu0 %v3925_v12  ;;  %v3947_v12 = vld [vmem:[%s4976_s9 + $0xf0] sm:$0xff]  }
 0x5f9   :  { %2045 = vmatprep.subr.bf16.mxu0 %v4008_v4 }
 0x5fc   :  { %2046 = vmatpush1.bf16.msra.mxu0 %v3927_v14  ;;  %v3949_v14 = vld [vmem:[%s4976_s9 + $0x100] sm:$0xff]  }
 0x5fd   :  { %2047 = vmatprep.subr.bf16.mxu0 %v4008_v4 }
 0x600   :  { %2048 = vmatpush1.bf16.msra.mxu0 %v3929_v16  ;;  %v2347_v16 = vld [vmem:[#allocation4 + $0x18] sm:$0x7] }
 0x601   :  { %2049 = vmatprep.subr.bf16.mxu0 %v4008_v4 }
 0x604   :  { %2050 = vmatpush1.bf16.msra.mxu0 %v3931_v18  ;;  %v2349_v18 = vpack.c.bf16 %v2347_v16, %v2345_v15 }
 0x605   :  { %2051 = vmatprep.subr.bf16.mxu0 %v4008_v4 }
 0x606   :  { %v2384_v20 = vshrl.u32 %v2349_v18, 16 }
 0x608   :  { %2052 = vmatpush1.bf16.msra.mxu0 %v3933_v22 }
 0x609   :  { %2053 = vmatprep.subr.bf16.mxu0 %v4008_v4 }
 0x6be   :  { %v1777_v28 = vpop.f32.mrb[16].mxu0 }
 0x6bf   :  { %v1785_v29 = vrot.slane %v1777_v28, 2  ;;  %v3767_v30 = vpop.f32.mrb[17].mxu0 }
 0x6c0   :  { %v1780_v31 = vpop.f32.mrb[18].mxu0  ;;  %v3935_v30 = vld [vmem:[%s4976_s9 + $0xa0] sm:$0xff]  }
 0x6c1   :  { %v1788_v32 = vsel %vm1787_vm11, %v1777_v28, %v1785_v29  ;;  %v3768_v33 = vpop.f32.mrb[19].mxu0  ;;  %2054 = vmatpush1.bf16.msra.mxu0 %v3935_v30 }
 0x6c2   :  { %v1790_v34 = vsel %vm1789_vm9, %v1788_v32, 0.0  ;;  %2055 = vmatprep.subr.bf16.mxu0 %v4008_v4  ;;  %v3938_v33 = vld [vmem:[%s4976_s9 + $0x58] sm:$0xff]  }
 0x6c3   :  { %v1791_v35 = vrot.slane %v1790_v34, 4  ;;  %2175 = vmatpush1.bf16.msra.mxu1 %v3938_v33  ;;  %v3957_v33 = vld [vmem:[%s4976_s9 + $0x140] sm:$0xff]  }
 0x6c4   :  { %2303 = vmatprep.subr.bf16.mxu1 %v4008_v4 }
 0x6c5   :  { %v1792_v36 = vadd.f32 %v1791_v35, %v1790_v34 }
 0x6c7   :  { %v1793_v37 = vrot.slane %v1792_v36, 2 }
 0x6c9   :  { %v1794_v38 = vadd.f32 %v1793_v37, %v1792_v36  ;;  %v3939_v36 = vld [vmem:[%s4976_s9 + $0xb0] sm:$0xff]  }
 0x6ca   :  { %v1889_v37 = vld [vmem:[#allocation4 + $0x8] sm:$0xff] }
 0x6cb   :  { %v1795_v39 = vrot.slane %v1794_v38, 1 }
 0x6cd   :  { %v1796_v40 = vadd.f32 %v1795_v39, %v1794_v38  ;;  %v1917_v38 = vld [vmem:[#allocation4 + $0x8] sm:$0xfe]  ;;  %v1919_v39 = vld [vmem:[#allocation4 + $0x18] sm:$0x1] }
 0x6cf   :  { %1798 = vrot.lane.b32.xlu1 %v1796_v40, %s4005_s20 }
 0x741   :  { %v1799_v41 = vpop.permute.xlu1 %1798 }
 0x742   :  { %v1801_v42 = vadd.f32 %v1799_v41, %v1796_v40  ;;  %v1891_v41 = vpack.c.bf16 %v1889_v37, %v1889_v37  ;;  %v3961_v37 = vld [vmem:[%s4976_s9 + $0x160] sm:$0xff]  }
 0x744   :  { %v1802_v43 = vmul.f32 0.125, %v1801_v42  ;;  %v1921_v42 = vpack.c.bf16 %v1919_v39, %v1917_v38  ;;  %3253 = vmatprep.mubr.msk.bf16.mxu1 %vm1112_vm5, %v1891_v41 }
 0x746   :  { %1804 = vrot.lane.b32.xlu0 %v1802_v43, %s4006_s21 }
 0x7b8   :  { %v1805_v44 = vpop.permute.xlu0 %1804 }
 0x7b9   :  { %v1807_v45 = vsel %vm1145_vm7, %v1802_v43, %v1805_v44  ;;  %v1957_v44 = vshll.u32 %v1921_v42, 16 }
 0x7ba   :  { %v1811_v46 = vrot.slane %v1807_v45, %v4387_v51  ;;  %v3941_v45 = vld [vmem:[%s4976_s9 + $0xb8] sm:$0xff]  }
 0x7bc   :  { %v4607_v47 = vsub.f32 %v1788_v32, %v1811_v46  ;;  %v3937_v32 = vld [vmem:[%s4976_s9 + $0xa8] sm:$0xff]   ;;  %v1955_v46 = vshrl.u32 %v1921_v42, 16  ;;  %v3963_v42 = vld [vmem:[%s4976_s9 + $0x170] sm:$0xff]  }
 0x7bd   :  { %2056 = vmatpush1.bf16.msra.mxu0 %v3937_v32  ;;  %v3956_v32 = vld [vmem:[%s4976_s9 + $0x138] sm:$0xff]  }
 0x7be   :  { %v1813_v48 = vmul.f32 %v4607_v47, %v4607_v47  ;;  %2057 = vmatprep.subr.bf16.mxu0 %v4008_v4 }
 0x7c0   :  { %v1814_v49 = vsel %vm1789_vm9, %v1813_v48, 0.0 }
 0x7c1   :  { %v1815_v52 = vrot.slane %v1814_v49, 4  ;;  %2058 = vmatpush1.bf16.msra.mxu0 %v3939_v36  ;;  %v3960_v36 = vld [vmem:[%s4976_s9 + $0x158] sm:$0xff]  }
 0x7c2   :  { %2059 = vmatprep.subr.bf16.mxu0 %v4008_v4 }
 0x7c3   :  { %v1816_v53 = vadd.f32 %v1815_v52, %v1814_v49 }
 0x7c5   :  { %v1817_v54 = vrot.slane %v1816_v53, 2  ;;  %2060 = vmatpush1.bf16.msra.mxu0 %v3941_v45  ;;  %v2509_v45 = vld [vmem:[#allocation4 + $0x8] sm:$0xf0] }
 0x7c7   :  { %v1818_v55 = vadd.f32 %v1817_v54, %v1816_v53 }
 0x7c9   :  { %v1819_v56 = vrot.slane %v1818_v55, 1 }
 0x7cb   :  { %v1820_v57 = vadd.f32 %v1819_v56, %v1818_v55  ;;  %v2193_v56 = vld [vmem:[#allocation4 + $0x8] sm:$0xfc] }
 0x7cd   :  { %1822 = vrot.lane.b32.xlu1 %v1820_v57, %s4005_s20 }
 0x7d1   :  { %1851 = vrot.lane.b32.xlu1 %v1850_v59, %s4006_s21  ;;  %v3940_v59 = vld [vmem:[%s4976_s9 + $0xc0] sm:$0xff]  }
 0x83f   :  { %v1823_v60 = vpop.permute.xlu1 %1822 }
 0x840   :  { %v1825_v61 = vadd.f32 %v1823_v60, %v1820_v57  ;;  %v2195_v57 = vld [vmem:[#allocation4 + $0x18] sm:$0x3] }
 0x842   :  { %v1826_v62 = vmul.f32 0.125, %v1825_v61 }
 0x843   :  { %v1852_v21 = vpop.permute.xlu1 %1851 }
 0x844   :  { %v1828_v63 = vadd.f32 1e-05, %v1826_v62  ;;  %v1854_v23 = vsel %vm1145_vm7, %v4616_v58, %v1852_v21  ;;  %v2197_v58 = vpack.c.bf16 %v2195_v57, %v2193_v56  ;;  %v2387_v21 = vshll.u32 %v2349_v18, 16  ;;  %v3966_v56 = vld [vmem:[%s4976_s9 + $0x188] sm:$0xff]   ;;  %v3967_v57 = vld [vmem:[%s4976_s9 + $0x190] sm:$0xff]  }
 0x845   :  { %v1858_v29 = vrot.slane %v1854_v23, %v4387_v51 }
 0x846   :  { %3995 = vrsqrt.f32 %v1828_v63  ;;  %v2226_v63 = vrot.slane %v2197_v58, 1  ;;  %v2389_v26 = vrot.slane %v2387_v21, 2  ;;  %v3968_v58 = vld [vmem:[%s4976_s9 + $0x198] sm:$0xff]  }
 0x850   :  { %v3996_v1 = vpop.eup %3995 }
 0x851   :  { %v4624_v2 = vmul.f32 %v3996_v1, %v1827_v0 }
 0x853   :  { %v1836_v3 = vrot.slane %v4624_v2, %v4387_v51 }
 0x855   :  { %1837 = vrot.lane.b32.xlu0 %v1836_v3, %s4006_s21  ;;  %v3942_v3 = vld [vmem:[%s4976_s9 + $0xc8] sm:$0xff]  }
 0x8c7   :  { %v1838_v25 = vpop.permute.xlu0 %1837 }
 0x8c8   :  { %v1840_v27 = vsel %vm1145_vm7, %v4624_v2, %v1838_v25  ;;  %v2386_v25 = vrot.slane %v2384_v20, 1 }
 0x8c9   :  { %v1844_v28 = vrot.slane %v1840_v27, %v4387_v51 }
 0x8cb   :  { %v1845_v31 = vmul.f32 %v1844_v28, %v4607_v47  ;;  %v1959_v47 = vrot.slane %v1957_v44, 1  ;;  %v3953_v28 = vld [vmem:[%s4976_s9 + $0x120] sm:$0xff]  }
 0x8cd   :  { %v1859_v34 = vadd.f32 %v1858_v29, %v1845_v31  ;;  %v1960_v48 = vor.u32 %v1959_v47, %v1955_v46  ;;  %v2390_v29 = vor.u32 %v2389_v26, %v2386_v25  ;;  %v3955_v31 = vld [vmem:[%s4976_s9 + $0x130] sm:$0xff]   ;;  %v2511_v46 = vld [vmem:[#allocation4 + $0x18] sm:$0xf]  ;;  %v3964_v47 = vld [vmem:[%s4976_s9 + $0x178] sm:$0xff]  }
 0x8cf   :  { %v1860_v35 = vmul.f32 0.2, %v1859_v34  ;;  %3240 = vmatprep.mubr.msk.bf16.mxu0 %vm1112_vm5, %v1960_v48  ;;  %v2513_v48 = vpack.c.bf16 %v2511_v46, %v2509_v45  ;;  %v3981_v45 = vld [vmem:[%s4978_s12 + $0x50] sm:$0xff]  }
 0x8d0   :  { %v3982_v46 = vld [vmem:[%s4978_s12 + $0x10] sm:$0xff]  }
 0x8d1   :  { %v1861_v40 = vmax.f32 %v1859_v34, %v1860_v35  ;;  %v3958_v34 = vld [vmem:[%s4976_s9 + $0x148] sm:$0xff]   ;;  %v3959_v35 = vld [vmem:[%s4976_s9 + $0x150] sm:$0xff]  }
 0x8d3   :  { %1867 = vrot.lane.b32.xlu0 %v1861_v40, %s4009_s6  ;;  %v1880_v43 = vrot.slane %v1861_v40, 2  ;;  %v3962_v40 = vld [vmem:[%s4976_s9 + $0x168] sm:$0xff]  }
 0x8d5   :  { %1881 = vrot.lane.b32.xlu1 %v1880_v43, %s4009_s6 }
 0x945   :  { %v1868_v49 = vpop.permute.xlu0 %1867 }
 0x946   :  { %v1870_v52 = vsel %vm1112_vm5, 0.0, %v1868_v49 }
 0x947   :  { %v1873_v53 = vrot.slane %v1870_v52, 6  ;;  %v1882_v54 = vpop.permute.xlu1 %1881 }
 0x948   :  { %v1884_v55 = vsel %vm1112_vm5, 0.0, %v1882_v54  ;;  %v2542_v54 = vrot.slane %v2513_v48, 2 }
 0x949   :  { %1877 = vst [vmem:[#allocation4] sm:$0xc] %v1873_v53  ;;  %1885 = vst [vmem:[#allocation4 + $0x10] sm:$0x3] %v1884_v55  ;;  %v3965_v53 = vld [vmem:[%s4976_s9 + $0x180] sm:$0xff]  }
 0x950   :  { %v1888_v60 = vld [vmem:[#allocation4] sm:$0xff]  ;;  %v1918_v62 = vld [vmem:[#allocation4 + $0x10] sm:$0x1] }
 0x951   :  { %v1916_v61 = vld [vmem:[#allocation4] sm:$0xfe]  ;;  %v1890_v0 = vpack.c.bf16 %v1888_v60, %v1888_v60  ;;  %v2194_v23 = vld [vmem:[#allocation4 + $0x10] sm:$0x3] }
 0x952   :  { %v1920_v1 = vpack.c.bf16 %v1918_v62, %v1916_v61  ;;  %v2192_v22 = vld [vmem:[#allocation4] sm:$0xfc]  ;;  %v2346_v39 = vld [vmem:[#allocation4 + $0x10] sm:$0x7]  ;;  %v3971_v61 = vld [vmem:[%s4976_s9 + $0x1b0] sm:$0xff]  }
 0x953   :  { %2185 = vmatmul.mubr.bf16.vlgmr.msra.gmra.mrb[12].mxu1 %v1890_v0  ;;  %v2196_v27 = vpack.c.bf16 %v2194_v23, %v2192_v22  ;;  %v2344_v38 = vld [vmem:[#allocation4] sm:$0xf8]  ;;  %v3972_v62 = vld [vmem:[%s4976_s9 + $0x1b8] sm:$0xff]  }
 0x954   :  { %v1950_v2 = vshll.u32 %v1920_v1, 16  ;;  %2304 = vmatpush1.bf16.msra.mxu1 %v3940_v59  ;;  %3290 = vmatprep.mubr.msk.bf16.mxu1 %vm1112_vm5, %v2226_v63  ;;  %v1948_v5 = vshrl.u32 %v1920_v1, 16  ;;  %v2348_v41 = vpack.c.bf16 %v2346_v39, %v2344_v38  ;;  %v3969_v59 = vld [vmem:[%s4976_s9 + $0x1a0] sm:$0xff]   ;;  %v3970_v60 = vld [vmem:[%s4976_s9 + $0x1a8] sm:$0xff]   ;;  %v3975_v1 = vld [vmem:[%s4976_s9 + $0x1d0] sm:$0xff]  }
 0x955   :  { %2305 = vmatprep.subr.bf16.mxu1 %v4008_v4  ;;  %v2225_v30 = vrot.slane %v2196_v27, 1  ;;  %v3973_v63 = vld [vmem:[%s4976_s9 + $0x1c0] sm:$0xff]   ;;  %v3974_v0 = vld [vmem:[%s4976_s9 + $0x1c8] sm:$0xff]  }
 0x956   :  { %v1952_v7 = vrot.slane %v1950_v2, 1  ;;  %v2376_v43 = vshrl.u32 %v2348_v41, 16  ;;  %v2379_v44 = vshll.u32 %v2348_v41, 16  ;;  %v2508_v2 = vld [vmem:[#allocation4] sm:$0xf0]  ;;  %v3977_v41 = vld [vmem:[%s4978_s12 + $0x40] sm:$0xff]  }
 0x957   :  { %v2705_v39 = vld [vmem:[%s4977_s11] sm:$0x1]  ;;  %3497 = vmatprep.subr.bf16.mxu0 %v3977_v41 }
 0x958   :  { %v1953_v8 = vor.u32 %v1952_v7, %v1948_v5  ;;  %2306 = vmatpush1.bf16.msra.mxu1 %v3942_v3  ;;  %v2378_v49 = vrot.slane %v2376_v43, 1  ;;  %v2381_v52 = vrot.slane %v2379_v44, 2  ;;  %v2510_v3 = vld [vmem:[#allocation4 + $0x10] sm:$0xf]  ;;  %v3979_v43 = vld [vmem:[%s4978_s12 + $0x48] sm:$0xff]  }
 0x959   :  { %2307 = vmatprep.subr.bf16.mxu1 %v4008_v4  ;;  %v3976_v5 = vld [vmem:[%s4976_s9 + $0x1d8] sm:$0xff]   ;;  %v2512_v7 = vpack.c.bf16 %v2510_v3, %v2508_v2  ;;  %v3980_v44 = vld [vmem:[%s4978_s12 + $0x8] sm:$0xff]  }
 0x95a   :  { %2070 = vmatmul.mubr.bf16.vlgmr.msra.gmra.mrb[20].mxu0 %v1953_v8  ;;  %v2382_v55 = vor.u32 %v2381_v52, %v2378_v49  ;;  %v3992_v2 = vld [vmem:[%s4978_s12 + $0x38] sm:$0xff]  }
 0x95b   :  { %v2541_v8 = vrot.slane %v2512_v7, 2 }
 0x95c   :  { %2308 = vmatpush1.bf16.msra.mxu1 %v3943_v9 }
 0x95d   :  { %2309 = vmatprep.subr.bf16.mxu1 %v4008_v4 }
 0x960   :  { %2310 = vmatpush1.bf16.msra.mxu1 %v3944_v50 }
 0x961   :  { %2311 = vmatprep.subr.bf16.mxu1 %v4008_v4 }
 0x964   :  { %2312 = vmatpush1.bf16.msra.mxu1 %v3945_v10 }
 0x965   :  { %2313 = vmatprep.subr.bf16.mxu1 %v4008_v4 }
 0x968   :  { %2314 = vmatpush1.bf16.msra.mxu1 %v3946_v11 }
 0x969   :  { %2315 = vmatprep.subr.bf16.mxu1 %v4008_v4 }
 0x96c   :  { %2316 = vmatpush1.bf16.msra.mxu1 %v3947_v12 }
 0x96d   :  { %2317 = vmatprep.subr.bf16.mxu1 %v4008_v4 }
 0x970   :  { %2318 = vmatpush1.bf16.msra.mxu1 %v3948_v13 }
 0x971   :  { %2319 = vmatprep.subr.bf16.mxu1 %v4008_v4 }
 0x974   :  { %2320 = vmatpush1.bf16.msra.mxu1 %v3949_v14 }
 0x975   :  { %2321 = vmatprep.subr.bf16.mxu1 %v4008_v4 }
 0x978   :  { %2322 = vmatpush1.bf16.msra.mxu1 %v3950_v17 }
 0x979   :  { %2323 = vmatprep.subr.bf16.mxu1 %v4008_v4 }
 0x97c   :  { %2324 = vmatpush1.bf16.msra.mxu1 %v3951_v19 }
 0x97d   :  { %2325 = vmatprep.subr.bf16.mxu1 %v4008_v4 }
 0x980   :  { %2326 = vmatpush1.bf16.msra.mxu1 %v3952_v24 }
 0x981   :  { %2467 = vmatprep.subr.bf16.mxu1 %v4008_v4 }
 0x983   :  { %2336 = vmatmul.mubr.bf16.vlgmr.msra.gmra.mrb[12].mxu1 %v2225_v30 }
 0x984   :  { %2468 = vmatpush1.bf16.msra.mxu1 %v3953_v28  ;;  %3327 = vmatprep.mubr.msk.bf16.mxu1 %vm1112_vm5, %v2390_v29 }
 0x985   :  { %2469 = vmatprep.subr.bf16.mxu1 %v4008_v4 }
 0x988   :  { %2470 = vmatpush1.bf16.msra.mxu1 %v3954_v6 }
 0x989   :  { %2471 = vmatprep.subr.bf16.mxu1 %v4008_v4 }
 0x98c   :  { %2472 = vmatpush1.bf16.msra.mxu1 %v3955_v31 }
 0x98d   :  { %2473 = vmatprep.subr.bf16.mxu1 %v4008_v4 }
 0x990   :  { %2474 = vmatpush1.bf16.msra.mxu1 %v3956_v32 }
 0x991   :  { %2475 = vmatprep.subr.bf16.mxu1 %v4008_v4 }
 0x994   :  { %2476 = vmatpush1.bf16.msra.mxu1 %v3957_v33 }
 0x995   :  { %2477 = vmatprep.subr.bf16.mxu1 %v4008_v4 }
 0x998   :  { %2478 = vmatpush1.bf16.msra.mxu1 %v3958_v34 }
 0x999   :  { %2479 = vmatprep.subr.bf16.mxu1 %v4008_v4 }
 0x99c   :  { %2480 = vmatpush1.bf16.msra.mxu1 %v3959_v35 }
 0x99d   :  { %2481 = vmatprep.subr.bf16.mxu1 %v4008_v4 }
 0x9a0   :  { %2482 = vmatpush1.bf16.msra.mxu1 %v3960_v36 }
 0x9a1   :  { %2483 = vmatprep.subr.bf16.mxu1 %v4008_v4 }
 0x9a4   :  { %2484 = vmatpush1.bf16.msra.mxu1 %v3961_v37 }
 0x9a5   :  { %2485 = vmatprep.subr.bf16.mxu1 %v4008_v4 }
 0x9a8   :  { %2486 = vmatpush1.bf16.msra.mxu1 %v3962_v40  ;;  %v2724_v40 = vrot.slane %v2705_v39, %v4387_v51 }
 0x9a9   :  { %2487 = vmatprep.subr.bf16.mxu1 %v4008_v4 }
 0x9ac   :  { %2488 = vmatpush1.bf16.msra.mxu1 %v3963_v42  ;;  %v3978_v42 = vld [vmem:[%s4978_s12] sm:$0xff]  }
 0x9ad   :  { %2489 = vmatprep.subr.bf16.mxu1 %v4008_v4  ;;  %3498 = vmatpush3.bf16.msra.mxu0 %v3978_v42 }
 0x9ae   :  { %3499 = vmatprep.subr.bf16.mxu0 %v3979_v43 }
 0x9b0   :  { %2490 = vmatpush1.bf16.msra.mxu1 %v3964_v47  ;;  %v3983_v47 = vld [vmem:[%s4978_s12 + $0x58] sm:$0xff]  }
 0x9b1   :  { %2619 = vmatprep.subr.bf16.mxu1 %v4008_v4  ;;  %3500 = vmatpush3.bf16.msra.mxu0 %v3980_v44 }
 0x9b2   :  { %3501 = vmatprep.subr.bf16.mxu0 %v3981_v45 }
 0x9b3   :  { %2500 = vmatmul.mubr.bf16.vlgmr.msra.gmra.mrb[12].mxu1 %v2382_v55  ;;  %v3985_v55 = vld [vmem:[%s4978_s12 + $0x60] sm:$0xff]  }
 0x9b4   :  { %2620 = vmatpush1.bf16.msra.mxu1 %v3965_v53  ;;  %3364 = vmatprep.mubr.msk.bf16.mxu1 %vm1112_vm5, %v2542_v54  ;;  %v3984_v54 = vld [vmem:[%s4978_s12 + $0x18] sm:$0xff]  }
 0x9b5   :  { %2621 = vmatprep.subr.bf16.mxu1 %v4008_v4  ;;  %3502 = vmatpush3.bf16.msra.mxu0 %v3982_v46 }
 0x9b6   :  { %3503 = vmatprep.subr.bf16.mxu0 %v3983_v47 }
 0x9b8   :  { %2622 = vmatpush1.bf16.msra.mxu1 %v3966_v56  ;;  %v3986_v56 = vld [vmem:[%s4978_s12 + $0x20] sm:$0xff]  }
 0x9b9   :  { %2623 = vmatprep.subr.bf16.mxu1 %v4008_v4  ;;  %3504 = vmatpush3.bf16.msra.mxu0 %v3984_v54 }
 0x9ba   :  { %3505 = vmatprep.subr.bf16.mxu0 %v3985_v55 }
 0x9bc   :  { %2624 = vmatpush1.bf16.msra.mxu1 %v3967_v57  ;;  %v2701_v57 = vld [vmem:[%s4979_s10] sm:$0x1] }
 0x9bd   :  { %2625 = vmatprep.subr.bf16.mxu1 %v4008_v4  ;;  %3506 = vmatpush3.bf16.msra.mxu0 %v3986_v56 }
 0x9c0   :  { %2626 = vmatpush1.bf16.msra.mxu1 %v3968_v58  ;;  %v3987_v58 = vld [vmem:[%s4978_s12 + $0x68] sm:$0xff]  }
 0x9c1   :  { %2627 = vmatprep.subr.bf16.mxu1 %v4008_v4  ;;  %3507 = vmatprep.subr.bf16.mxu0 %v3987_v58 }
 0x9c4   :  { %2628 = vmatpush1.bf16.msra.mxu1 %v3969_v59  ;;  %v3988_v59 = vld [vmem:[%s4978_s12 + $0x28] sm:$0xff]  }
 0x9c5   :  { %2629 = vmatprep.subr.bf16.mxu1 %v4008_v4  ;;  %3508 = vmatpush3.bf16.msra.mxu0 %v3988_v59 }
 0x9c8   :  { %2630 = vmatpush1.bf16.msra.mxu1 %v3970_v60 }
 0x9c9   :  { %2631 = vmatprep.subr.bf16.mxu1 %v4008_v4 }
 0x9cc   :  { %2632 = vmatpush1.bf16.msra.mxu1 %v3971_v61 }
 0x9cd   :  { %2633 = vmatprep.subr.bf16.mxu1 %v4008_v4 }
 0x9d0   :  { %2634 = vmatpush1.bf16.msra.mxu1 %v3972_v62  ;;  %v3989_v62 = vld [vmem:[%s4978_s12 + $0x70] sm:$0xff]  }
 0x9d1   :  { %2635 = vmatprep.subr.bf16.mxu1 %v4008_v4  ;;  %3509 = vmatprep.subr.bf16.mxu0 %v3989_v62 }
 0x9d4   :  { %2636 = vmatpush1.bf16.msra.mxu1 %v3973_v63  ;;  %v3990_v63 = vld [vmem:[%s4978_s12 + $0x30] sm:$0xff]  }
 0x9d5   :  { %2637 = vmatprep.subr.bf16.mxu1 %v4008_v4  ;;  %3510 = vmatpush3.bf16.msra.mxu0 %v3990_v63 }
 0x9d8   :  { %2638 = vmatpush1.bf16.msra.mxu1 %v3974_v0  ;;  %v3991_v0 = vld [vmem:[%s4978_s12 + $0x78] sm:$0xff]  }
 0x9d9   :  { %2639 = vmatprep.subr.bf16.mxu1 %v4008_v4  ;;  %3511 = vmatprep.subr.bf16.mxu0 %v3991_v0 }
 0x9da   :  { %3512 = vmatpush3.bf16.msra.mxu0 %v3992_v2 }
 0x9dc   :  { %2640 = vmatpush1.bf16.msra.mxu1 %v3975_v1 }
 0x9dd   :  { %2641 = vmatprep.subr.bf16.mxu1 %v4008_v4 }
 0x9e0   :  { %2642 = vmatpush1.bf16.msra.mxu1 %v3976_v5 }
 0x9e3   :  { %2652 = vmatmul.mubr.bf16.vlgmr.msra.gmra.mrb[12].mxu1 %v2541_v8 }
 0xa2d   :  { %v2071_v9 = vpop.f32.mrb[20].mxu0 }
 0xa2e   :  { %v2073_v50 = vpop.f32.mrb[21].mxu0 }
 0xa2f   :  { %v2074_v10 = vpop.f32.mrb[22].mxu0 }
 0xa30   :  { %v2075_v11 = vpop.f32.mrb[23].mxu0 }
 0xab6   :  { %v2653_v12 = vpop.f32.mrb[12].mxu1 }
 0xab7   :  { %v3771_v13 = vadd.f32 %v2653_v12, %v2071_v9  ;;  %v2655_v14 = vpop.f32.mrb[13].mxu1 }
 0xab8   :  { %v2656_v15 = vpop.f32.mrb[14].mxu1 }
 0xab9   :  { %v2661_v16 = vrot.slane %v3771_v13, 4  ;;  %v2657_v17 = vpop.f32.mrb[15].mxu1 }
 0xabb   :  { %v2663_v18 = vsel %vm1787_vm11, %v3771_v13, %v2661_v16 }
 0xabc   :  { %v2664_v19 = vsel %vm1110_vm6, %v2663_v18, 0.0 }
 0xabd   :  { %v2665_v20 = vrot.slane %v2664_v19, 4 }
 0xabf   :  { %v2666_v4 = vadd.f32 %v2665_v20, %v2664_v19 }
 0xac1   :  { %v2667_v21 = vrot.slane %v2666_v4, 2 }
 0xac3   :  { %v2668_v22 = vadd.f32 %v2667_v21, %v2666_v4  ;;  %v3365_v4 = vld [vmem:[%s4980_s13] ss:$0 sm:$0xff] }
 0xac5   :  { %v2669_v23 = vrot.slane %v2668_v22, 1 }
 0xac7   :  { %v2670_v24 = vadd.f32 %v2669_v23, %v2668_v22 }
 0xac9   :  { %2672 = vrot.lane.b32.xlu0 %v2670_v24, %s4009_s6 }
 0xb3b   :  { %v2673_v25 = vpop.permute.xlu0 %2672 }
 0xb3c   :  { %v2675_v26 = vadd.f32 %v2673_v25, %v2670_v24 }
 0xb3e   :  { %v2676_v27 = vmul.f32 0.125, %v2675_v26 }
 0xb40   :  { %2678 = vrot.lane.b32.xlu1 %v2676_v27, %s4009_s6 }
 0xbb2   :  { %v2679_v28 = vpop.permute.xlu1 %2678 }
 0xbb3   :  { %v2681_v29 = vsel %vm1112_vm5, %v2676_v27, %v2679_v28 }
 0xbb4   :  { %v2685_v30 = vrot.slane %v2681_v29, %v4387_v51 }
 0xbb6   :  { %v4892_v6 = vsub.f32 %v2663_v18, %v2685_v30 }
 0xbb8   :  { %v2687_v31 = vmul.f32 %v4892_v6, %v4892_v6 }
 0xbba   :  { %v2688_v32 = vsel %vm1110_vm6, %v2687_v31, 0.0 }
 0xbbb   :  { %v2689_v33 = vrot.slane %v2688_v32, 4 }
 0xbbd   :  { %v2690_v34 = vadd.f32 %v2689_v33, %v2688_v32 }
 0xbbf   :  { %v2691_v35 = vrot.slane %v2690_v34, 2 }
 0xbc1   :  { %v2692_v36 = vadd.f32 %v2691_v35, %v2690_v34 }
 0xbc3   :  { %v2693_v37 = vrot.slane %v2692_v36, 1 }
 0xbc5   :  { %v2694_v38 = vadd.f32 %v2693_v37, %v2692_v36 }
 0xbc7   :  { %2696 = vrot.lane.b32.xlu0 %v2694_v38, %s4009_s6 }
 0xbcb   :  { %2725 = vrot.lane.b32.xlu0 %v2724_v40, %s4009_s6 }
 0xc39   :  { %v2697_v48 = vpop.permute.xlu0 %2696 }
 0xc3a   :  { %v2699_v49 = vadd.f32 %v2697_v48, %v2694_v38 }
 0xc3c   :  { %v2700_v52 = vmul.f32 0.125, %v2699_v49 }
 0xc3d   :  { %v2726_v3 = vpop.permute.xlu0 %2725 }
 0xc3e   :  { %v2702_v53 = vadd.f32 1e-05, %v2700_v52  ;;  %v2728_v5 = vsel %vm1112_vm5, %v2705_v39, %v2726_v3 }
 0xc3f   :  { %v2732_v50 = vrot.slane %v2728_v5, %v4387_v51 }
 0xc40   :  { %3997 = vrsqrt.f32 %v2702_v53 }
 0xc4a   :  { %v3998_v60 = vpop.eup %3997 }
 0xc4b   :  { %v2704_v61 = vmul.f32 %v3998_v60, %v2701_v57 }
 0xc4d   :  { %v2710_v1 = vrot.slane %v2704_v61, %v4387_v51 }
 0xc4f   :  { %2711 = vrot.lane.b32.xlu1 %v2710_v1, %s4009_s6 }
 0xcc1   :  { %v2712_v7 = vpop.permute.xlu1 %2711 }
 0xcc2   :  { %v2714_v8 = vsel %vm1112_vm5, %v2704_v61, %v2712_v7 }
 0xcc3   :  { %v2718_v9 = vrot.slane %v2714_v8, %v4387_v51 }
 0xcc5   :  { %v2719_v10 = vmul.f32 %v2718_v9, %v4892_v6 }
 0xcc7   :  { %v2733_v11 = vadd.f32 %v2732_v50, %v2719_v10 }
 0xcc9   :  { %v2734_v12 = vmul.f32 0.2, %v2733_v11 }
 0xccb   :  { %v2735_v13 = vmax.f32 %v2733_v11, %v2734_v12 }
 0xccd   :  { %v2737_v14 = vrot.slane %v2735_v13, 1 }
 0xccf   :  { %v2739_v15 = vrot.slane %v2737_v14, 1  ;;  %v2742_v16 = vsel %vm2741_vm13, %v2735_v13, %v2737_v14 }
 0xcd0   :  { %v2744_v19 = vpack.c.bf16 %v2742_v16, %v2742_v16 }
 0xcd1   :  { %v2743_v17 = vsel %vm2741_vm13, %v2737_v14, %v2739_v15 }
 0xcd2   :  { %v2745_v18 = vpack.c.bf16 %v2743_v17, %v2743_v17 }
 0xcd4   :  { %2913 = vmatprep.mubr.bf16.mxu0 %v2745_v18 }
 0xcd5   :  { %2914 = vmatmul.mubr.bf16.vlgmr.msra.gmra.mrb[24].mxu0 %v2744_v19 }
 0xda8   :  { %v3513_v20 = vpop.f32.mrb[24].mxu0 }
 0xda9   :  { %v3514_v51 = vpop.f32.mrb[25].mxu0 }
 0xdaa   :  { %v3515_v21 = vadd.f32 %v3514_v51, %v3513_v20  ;;  %v3516_v22 = vpop.f32.mrb[26].mxu0 }
 0xdab   :  { %v3517_v23 = vpop.f32.mrb[27].mxu0 }
 0xdac   :  { %v2916_v24 = vadd.f32 %v3515_v21, %v3365_v4 }
 0xdae   :  { %2922 = vst.msk [vmem:[%s4981_s14] sm:$0x3] %vm2921_vm14, %v2916_v24 }

</bundles_post_ra>
